<compile_context>
chip_gen: v7x
topology: tpu7x:2x2x1
jax: 0.10.0
libtpu: 0.0.40
codegen_flags: <defaults>
</compile_context>

<pallas_src>
import numpy as np
import jax
import jax.numpy as jnp
from jax.experimental import pallas as pl
from jax.experimental.pallas import tpu as pltpu


_TARGET_BLOCK_BYTES = 2 << 20   # ~2 MiB/block; x2 double-buffer x (in+out) stays far under scoped VMEM


def _moveaxis_perm(ndim, source, destination):
    """Permutation `order` such that transpose(x, order) == moveaxis(x, source, destination)."""
    src = [int(s) % ndim for s in np.atleast_1d(source)]
    dst = [int(d) % ndim for d in np.atleast_1d(destination)]
    assert len(src) == len(dst)
    order = [a for a in range(ndim) if a not in src]
    for d, s in sorted(zip(dst, src)):
        order.insert(d, s)
    return tuple(order)


def _vmem_limit_bytes():
    """Scoped-VMEM limit: half of physical VMEM, capped at 64 MiB (v5e/v6e: 64 MiB, v7x: 32 MiB)."""
    try:
        phys = int(pltpu.get_tpu_info().vmem_capacity_bytes)
    except Exception:            # unknown chip / emulator: assume the smallest (v7x = 64 MiB)
        phys = 64 << 20
    return int(min(max(phys // 2, 16 << 20), 64 << 20))


def _compiler_params(n_grid_axes):
    return pltpu.CompilerParams(
        dimension_semantics=("parallel",) * n_grid_axes,
        vmem_limit_bytes=_vmem_limit_bytes(),
    )


def _sublane_multiple(dtype):
    """Second-to-last block dims must be a multiple of this (or the full extent)."""
    itemsize = np.dtype(dtype).itemsize
    return 8 * max(1, 4 // itemsize)          # f32: 8, bf16: 16, int8: 32


def _pick_tile(dim, row_bytes, sub, target_bytes=_TARGET_BLOCK_BYTES):
    """Largest t with t % sub == 0, dim % t == 0 and t*row_bytes <= target; else the full dim."""
    if dim * row_bytes <= target_bytes:
        return dim
    hi = min(dim, max(sub, (int(target_bytes // max(row_bytes, 1)) // sub) * sub))
    for t in range(hi, sub - 1, -sub):
        if dim % t == 0:
            return t
    return dim                                 # no aligned divisor: stay correct (block may be large)


def _fix_arity(fn, n):
    """Give a variadic index-map an exact positional arity (some Pallas versions introspect it)."""
    wrappers = {
        0: lambda: fn(),
        1: lambda a: fn(a),
        2: lambda a, b: fn(a, b),
        3: lambda a, b, c: fn(a, b, c),
        4: lambda a, b, c, d: fn(a, b, c, d),
        5: lambda a, b, c, d, e: fn(a, b, c, d, e),
        6: lambda a, b, c, d, e, f: fn(a, b, c, d, e, f),
    }
    return wrappers.get(n, fn)


def _in_spec(block, index_map, n_steps, itemsize):
    """Input BlockSpec; use 3-deep buffering once the pipeline is long and blocks are modest."""
    blk_bytes = int(np.prod(block)) * itemsize
    if n_steps >= 16 and blk_bytes <= _TARGET_BLOCK_BYTES:
        try:
            return pl.BlockSpec(block, index_map, pipeline_mode=pl.Buffered(3))
        except Exception:                      # older Pallas without pipeline_mode / Buffered
            pass
    return pl.BlockSpec(block, index_map)


# --------------------------------------------------------------------------------------
# Path A: permutation leaves the last two axes untouched  (order[-2:] == (ndim-2, ndim-1))
# --------------------------------------------------------------------------------------
def _moveaxis_trailing_preserved(x, order):
    """The reorder is expressed purely through index maps; the kernel is a pure copy."""
    ndim, shape = x.ndim, x.shape
    itemsize = np.dtype(x.dtype).itemsize
    out_shape = tuple(shape[a] for a in order)

    n_lead = ndim - 2
    sub = _sublane_multiple(x.dtype)
    tile = _pick_tile(shape[ndim - 2], shape[ndim - 1] * itemsize, sub)
    n_tiles = shape[ndim - 2] // tile

    grid = tuple(out_shape[o] for o in range(n_lead)) + (n_tiles,)
    grid_pos = {a: order.index(a) for a in range(n_lead)}     # input axis -> grid axis

    def in_map(*g):
        idx = []
        for a in range(ndim):
            if a < n_lead:
                idx.append(g[grid_pos[a]])
            elif a == ndim - 2:
                idx.append(g[n_lead])
            else:
                idx.append(0)
        return tuple(idx)

    def out_map(*g):
        return tuple(g[:n_lead]) + (g[n_lead], 0)

    block = (1,) * n_lead + (tile, shape[ndim - 1])

    def copy_kernel(x_ref, o_ref):
        o_ref[...] = x_ref[...]

    return pl.pallas_call(
        copy_kernel,
        out_shape=jax.ShapeDtypeStruct(out_shape, x.dtype),
        grid=grid,
        in_specs=[_in_spec(block, _fix_arity(in_map, len(grid)), int(np.prod(grid)), itemsize)],
        out_specs=pl.BlockSpec(block, _fix_arity(out_map, len(grid))),
        compiler_params=_compiler_params(len(grid)),
    )(x)


# --------------------------------------------------------------------------------------
# Path B: a single axis moved to the last position (e.g. NCHW -> NHWC, source=1, dest=-1)
# --------------------------------------------------------------------------------------
def _moveaxis_to_last(x, order, src):
    ndim, shape = x.ndim, x.shape
    itemsize = np.dtype(x.dtype).itemsize
    out_shape = tuple(shape[a] for a in order)       # (..., W, C)

    lead = order[:-2]                                # input axes feeding the leading output dims
    n_lead = len(lead)
    C, W = shape[src], shape[ndim - 1]

    # Tile the input axis feeding the last leading output dim; it sits second-to-last in
    # both the input block and the (collapsed) output block, so keep it 8-aligned or full.
    ta = lead[-1]
    sub = _sublane_multiple(x.dtype)
    tile = _pick_tile(shape[ta], C * W * itemsize, sub)
    n_tiles = shape[ta] // tile

    grid = tuple(n_tiles if lead[o] == ta else shape[lead[o]] for o in range(n_lead))
    grid_pos = {lead[o]: o for o in range(n_lead)}   # input axis -> grid axis

    in_block = tuple(
        shape[a] if a in (src, ndim - 1) else (tile if a == ta else 1) for a in range(ndim))

    def in_map(*g):
        return tuple(0 if a in (src, ndim - 1) else g[grid_pos[a]] for a in range(ndim))

    lead_block = tuple(tile if lead[o] == ta else 1 for o in range(n_lead))
    n_steps = int(np.prod(grid))
    in_spec = _in_spec(in_block, _fix_arity(in_map, len(grid)), n_steps, itemsize)

    # TODO(synk): for bf16/int8, pack lanes via pltpu.bitcast (2x bf16 -> u32) before the
    # relayout to halve/quarter the lane-crossing work.

    # ---- primary: lane-dense output (trailing (W, C) collapsed to a W*C axis) ----------
    collapsed_shape = tuple(shape[a] for a in lead) + (W * C,)
    dense_block = lead_block + (W * C,)

    def dense_out_map(*g):
        return tuple(g) + (0,)

    def dense_kernel(x_ref, o_ref):
        t = jnp.transpose(x_ref[...], order)          # (..., tile, W, C) relayout in VMEM
        o_ref[...] = t.reshape(o_ref.shape)           # interleave (W, C) -> W*C lanes (dense vst)

    try:
        out = jax.block_until_ready(pl.pallas_call(
            dense_kernel,
            out_shape=jax.ShapeDtypeStruct(collapsed_shape, x.dtype),
            grid=grid,
            in_specs=[in_spec],
            out_specs=pl.BlockSpec(dense_block, _fix_arity(dense_out_map, len(grid))),
            compiler_params=_compiler_params(len(grid)),
        )(x))
        return out.reshape(out_shape)                 # contiguous split W*C -> (W, C): free
    except Exception:
        pass   # this Mosaic version rejected the lane-collapsing reshape: use natural layout

    # ---- fallback: natural (..., W, C) output layout, same tiling ----------------------
    plain_block = lead_block + (W, C)

    def plain_out_map(*g):
        return tuple(g) + (0, 0)

    def plain_kernel(x_ref, o_ref):
        o_ref[...] = jnp.transpose(x_ref[...], order)

    return pl.pallas_call(
        plain_kernel,
        out_shape=jax.ShapeDtypeStruct(out_shape, x.dtype),
        grid=grid,
        in_specs=[in_spec],
        out_specs=pl.BlockSpec(plain_block, _fix_arity(plain_out_map, len(grid))),
        compiler_params=_compiler_params(len(grid)),
    )(x)


# --------------------------------------------------------------------------------------
# Path C: general fallback (e.g. last axis moved forward, pure 2-D transpose)
# --------------------------------------------------------------------------------------
def _moveaxis_general(x, order):
    ndim, shape = x.ndim, x.shape
    out_shape = tuple(shape[a] for a in order)

    grid_out_axes = [o for o in range(max(ndim - 2, 0)) if order[o] < ndim - 2]
    grid = tuple(out_shape[o] for o in grid_out_axes)
    grid_pos = {order[o]: i for i, o in enumerate(grid_out_axes)}     # input axis -> grid axis
    gridded_out = set(grid_out_axes)

    in_block = tuple(1 if a in grid_pos else shape[a] for a in range(ndim))
    out_block = tuple(1 if o in gridded_out else out_shape[o] for o in range(ndim))

    def in_map(*g):
        return tuple(g[grid_pos[a]] if a in grid_pos else 0 for a in range(ndim))

    def out_map(*g):
        by_out = {o: g[i] for i, o in enumerate(grid_out_axes)}
        return tuple(by_out.get(o, 0) for o in range(ndim))

    def kernel(x_ref, o_ref):
        o_ref[...] = jnp.transpose(x_ref[...], order)

    # TODO(synk): permutations landing here could be tiled further along untouched trailing
    # axes (as in the move-to-last path); kept whole-block-per-grid-point for clarity.
    if grid:
        kwargs = dict(grid=grid, compiler_params=_compiler_params(len(grid)))
    else:
        kwargs = dict(compiler_params=pltpu.CompilerParams(vmem_limit_bytes=_vmem_limit_bytes()))

    return pl.pallas_call(
        kernel,
        out_shape=jax.ShapeDtypeStruct(out_shape, x.dtype),
        in_specs=[pl.BlockSpec(in_block, _fix_arity(in_map, len(grid)))],
        out_specs=pl.BlockSpec(out_block, _fix_arity(out_map, len(grid))),
        **kwargs,
    )(x)


# --------------------------------------------------------------------------------------
def moveaxis_pallas(x, source, destination):
    """Pallas implementation of torch-style moveaxis(x, source, destination)."""
    ndim = x.ndim
    order = _moveaxis_perm(ndim, source, destination)

    if ndim >= 2 and order[-2:] == (ndim - 2, ndim - 1):
        return _moveaxis_trailing_preserved(x, order)

    srcs = [int(s) % ndim for s in np.atleast_1d(source)]
    dsts = [int(d) % ndim for d in np.atleast_1d(destination)]
    if ndim >= 3 and len(srcs) == 1 and dsts[0] == ndim - 1 and srcs[0] != ndim - 1:
        return _moveaxis_to_last(x, order, srcs[0])

    return _moveaxis_general(x, order)


class MoveAxis:
    """Mirror of dpipe.layers.shape.MoveAxis (no parameters)."""

    def __init__(self, source, destination):
        self.source, self.destination = source, destination

    def __call__(self, x):
        return moveaxis_pallas(x, self.source, self.destination)


if __name__ == "__main__":
    key = jax.random.PRNGKey(0)
    # NCHW input: batch=2, channels=4, spatial=16x16
    x = jax.random.normal(key, (2, 4, 16, 16), dtype=jnp.float32)

    # Spec'd case: NCHW -> NHWC (channel axis to the last position).
    module = MoveAxis(source=1, destination=-1)
    out = jax.block_until_ready(module(x))
    ref = jnp.moveaxis(x, 1, -1)
    assert out.shape == ref.shape, (out.shape, ref.shape)
    assert out.dtype == ref.dtype
    np.testing.assert_array_equal(np.asarray(out), np.asarray(ref))

    # Pure index-map path (no in-kernel transpose): move the batch axis 0 -> 1.
    out2 = jax.block_until_ready(MoveAxis(0, 1)(x))
    np.testing.assert_array_equal(np.asarray(out2), np.asarray(jnp.moveaxis(x, 0, 1)))

    print("KERNEL_OK")
</pallas_src>

<mosaic_0001>
module attributes {stable_mosaic.version = 11 : i64} {
  func.func @dense_kernel(%arg0: i32, %arg1: i32, %arg2: memref<1x4x16x16xf32, #tpu.memory_space<vmem>>, %arg3: memref<1x16x64xf32, #tpu.memory_space<vmem>>) attributes {dimension_semantics = [#tpu.dimension_semantics<parallel>, #tpu.dimension_semantics<parallel>], iteration_bounds = array<i64: 2, 1>, scalar_prefetch = 0 : i64, scratch_operands = 0 : i64, tpu.core_type = #tpu.core_type<tc>, window_params = [{transform_indices = @transform_0, window_bounds = array<i64: 1, 4, 16, 16>}, {transform_indices = @transform_1, window_bounds = array<i64: 1, 16, 64>}]} {
    %c0 = arith.constant 0 : index
    %c0_0 = arith.constant 0 : index
    %c0_1 = arith.constant 0 : index
    %c0_2 = arith.constant 0 : index
    %0 = vector.load %arg2[%c0, %c0_0, %c0_1, %c0_2] : memref<1x4x16x16xf32, #tpu.memory_space<vmem>>, vector<1x4x16x16xf32>
    %1 = tpu.transpose %0, [0, 2, 3, 1] : vector<1x4x16x16xf32> -> vector<1x16x16x4xf32>
    %2 = vector.shape_cast %1 : vector<1x16x16x4xf32> to vector<1x16x64xf32>
    %c0_3 = arith.constant 0 : index
    %c0_4 = arith.constant 0 : index
    %c0_5 = arith.constant 0 : index
    %3 = vector.load %arg3[%c0_3, %c0_4, %c0_5] : memref<1x16x64xf32, #tpu.memory_space<vmem>>, vector<1x16x64xf32>
    tpu.vector_store %arg3[%c0_3, %c0_4, %c0_5], %2 {strides = array<i32>} : memref<1x16x64xf32, #tpu.memory_space<vmem>>, vector<1x16x64xf32>,
    return
  }
  func.func @transform_0(%arg0: i32, %arg1: i32) -> (i32, i32, i32, i32) {
    %c0_i32 = arith.constant 0 : i32
    %c0_i32_0 = arith.constant 0 : i32
    %c0_i32_1 = arith.constant 0 : i32
    return %arg0, %c0_i32, %arg1, %c0_i32_0 : i32, i32, i32, i32
  }
  func.func @transform_1(%arg0: i32, %arg1: i32) -> (i32, i32, i32) {
    %c0_i32 = arith.constant 0 : i32
    %c0_i32_0 = arith.constant 0 : i32
    return %arg0, %arg1, %c0_i32 : i32, i32, i32
  }
}

module attributes {stable_mosaic.version = 11 : i64} {
  func.func @plain_kernel(%arg0: i32, %arg1: i32, %arg2: memref<1x4x16x16xf32, #tpu.memory_space<vmem>>, %arg3: memref<1x16x16x4xf32, #tpu.memory_space<vmem>>) attributes {dimension_semantics = [#tpu.dimension_semantics<parallel>, #tpu.dimension_semantics<parallel>], iteration_bounds = array<i64: 2, 1>, scalar_prefetch = 0 : i64, scratch_operands = 0 : i64, tpu.core_type = #tpu.core_type<tc>, window_params = [{transform_indices = @transform_0, window_bounds = array<i64: 1, 4, 16, 16>}, {transform_indices = @transform_1, window_bounds = array<i64: 1, 16, 16, 4>}]} {
    %c0 = arith.constant 0 : index
    %c0_0 = arith.constant 0 : index
    %c0_1 = arith.constant 0 : index
    %c0_2 = arith.constant 0 : index
    %0 = vector.load %arg2[%c0, %c0_0, %c0_1, %c0_2] : memref<1x4x16x16xf32, #tpu.memory_space<vmem>>, vector<1x4x16x16xf32>
    %1 = tpu.transpose %0, [0, 2, 3, 1] : vector<1x4x16x16xf32> -> vector<1x16x16x4xf32>
    %c0_3 = arith.constant 0 : index
    %c0_4 = arith.constant 0 : index
    %c0_5 = arith.constant 0 : index
    %c0_6 = arith.constant 0 : index
    %2 = vector.load %arg3[%c0_3, %c0_4, %c0_5, %c0_6] : memref<1x16x16x4xf32, #tpu.memory_space<vmem>>, vector<1x16x16x4xf32>
    tpu.vector_store %arg3[%c0_3, %c0_4, %c0_5, %c0_6], %1 {strides = array<i32>} : memref<1x16x16x4xf32, #tpu.memory_space<vmem>>, vector<1x16x16x4xf32>,
    return
  }
  func.func @transform_0(%arg0: i32, %arg1: i32) -> (i32, i32, i32, i32) {
    %c0_i32 = arith.constant 0 : i32
    %c0_i32_0 = arith.constant 0 : i32
    %c0_i32_1 = arith.constant 0 : i32
    return %arg0, %c0_i32, %arg1, %c0_i32_0 : i32, i32, i32, i32
  }
  func.func @transform_1(%arg0: i32, %arg1: i32) -> (i32, i32, i32, i32) {
    %c0_i32 = arith.constant 0 : i32
    %c0_i32_0 = arith.constant 0 : i32
    %c0_i32_1 = arith.constant 0 : i32
    return %arg0, %arg1, %c0_i32, %c0_i32_0 : i32, i32, i32, i32
  }
}

</mosaic_0001>

<bundles_post_ra>
// kernel: tpu_custom_call.1
= control target key start
LH: loop header
LB: loop body
LE: loop exit
PB: predicated region body
PF: predicated region fallthrough
CT: control target
= control target key end

     0   :  { %6 = vsyncpa [#allocation3], 0  ;;  %s3049_s0 = inlined_call_operand.hbm [shape: f32[2,4,16,16], index: 0, kind: input, shape index: {}]   ;;  %s3050_s1 = inlined_call_operand.hbm [shape: f32[2,16,64], index: 1, kind: output, shape index: {}]  }
   0x1   :  { %8 = vsyncpa [#allocation3 + $0x1], 0 }
   0x2   :  { %9 = vsyncpa [#allocation4], 0 }
   0x3   :  { %11 = vsyncpa [#allocation4 + $0x1], 0  ;;  %s2577_s6 = smov 0   ;;  %s2579_s7 = smov 0  }
   0x4   :  { %s2581_s8 = smov 0   ;;  %s2583_s9 = smov 0  }
   0x5   :  { %s2585_s10 = smov 0   ;;  %s2587_s11 = smov 0  }
   0x6 LB: > { %s2298_s12 = sadd.s32 4294967295, %s2542_s11   ;;  %s2299_s13 = sadd.s32 4294967294, %s2542_s11   ;;  %s2542_s11 = sphi %s2587_s11, %s17_s11   ;;  %s2538_s10 = sphi %s2585_s10, %s3065_s10   ;;  %s2534_s9 = sphi %s2583_s9, %s3064_s9   ;;  %s2530_s8 = sphi %s2581_s8, %s3063_s8   ;;  %s2526_s7 = sphi %s2579_s7, %s3062_s7   ;;  %s2522_s6 = sphi %s2577_s6, %s3061_s6  }
   0x7   : > { %s29_s14 = sadd.s32 1, %s2538_s10  ;;  %s38_s15 = sadd.s32 1, %s2530_s8 }
   0x8   : > { %p31_p0 = scmp.ge.s32.totalorder %s29_s14, 2  ;;  %p45_p1 = scmp.ne.s32.totalorder %s2530_s8, %s2526_s7 }
   0x9   : > { %p46_p2 = scmp.eq.s32.totalorder %s2542_s11, 0  ;;  %p51_p3 = scmp.ne.s32.totalorder %s2526_s7, %s2522_s6 }
   0xa   : > { %s3067_s14 = smov (%p31_p0, %s29_s14), 0  ;;  %p52_p5 = scmp.eq.s32.totalorder %s2298_s12, 0 }
   0xb   : > { %p2618_p4 = por %p46_p2, %p45_p1  ;;  %s33_s17 = ssub.s32 %s2538_s10, %s3067_s14 }
   0xc   : > { %p77_p6 = scmp.eq.s32.totalorder %s2298_s12, 1  ;;  %p36_p7 = scmp.eq.s32.totalorder %s33_s17, 0 }
   0xd   : > { %p2624_p8 = por %p52_p5, %p51_p3  ;;  %p83_p10 = scmp.eq.s32.totalorder %s2299_s13, 1 }
   0xe   : > { %p2628_p9 = por %p77_p6, %p45_p1  ;;  %p2359_p13 = scmp.lt.s32.totalorder %s2542_s11, 2 }
   0xf   : > { %s2633_s20 = scalar_select %p36_p7, %s2530_s8, %s38_s15  }
  0x10   : > { %s3054_s19 = scalar_select %p2628_p9, 1, 0 }
  0x11   : > { %p2635_p11 = por %p83_p10, %p51_p3  ;;  %s103_s22 = sand.u32 1, %s2530_s8  }
  0x12   : > { %s2302_s23 = sshll.u32 %s103_s22, 6  ;;  %s2345_s24 = sshll.u32 %s2538_s10, 10 }
  0x13   : > { %s3055_s21 = scalar_select %p2635_p11, 1, 0 }
  0x14   : > { %s2646_s27 = scalar_lea.hbm %s3049_s0, %s2345_s24  ;;  %s107_s28 = scalar_lea.vmem [#allocation2], %s2302_s23 }
  0x15   : > { %s116_s29 = sshll.u32 %s107_s28, 4  ;;  %p2652_p0 = pnand %p2359_p13, %p2618_p4  ;;  %s2648_s29 = int_to_ptr.vmem [resolvable:$true] %s116_s29 }
  0x16   : > { %s2657_s2 = scalar_lea.sflag [#allocation3], %s103_s22  ;;  %s2430_s3 = scalar_lea.hbm %s2646_s27, 1024 }
  0x17   : > { %p2431_p2 = scmp.ne.s32.totalorder %s2646_s27, %s2430_s3  ;;  %p2432_p3 = pneg %p2652_p0 }
  0x18   : > { %s2435_s12 = scalar_lea.hbm %s3049_s0, 2048  ;;  %p2436_p4 = scmp.lt.u32.totalorder %s2646_s27, %s3049_s0 }
  0x19   : > { %p2433_p5 = pnand %p2432_p3, %p2431_p2  ;;  %p2437_p7 = scmp.lt.u32.totalorder %s2435_s12, %s2430_s3 }
  0x1a   : > { %p2439_p13 = scmp.lt.u32.totalorder %s2430_s3, %s2646_s27 }
  0x1b   : > { %p2434_p6 = pneg %p2433_p5  ;;  %p2438_p10 = por %p2437_p7, %p2436_p4 }
  0x1d   : > { %p2440_p12 = por %p2439_p13, %p2438_p10 }
  0x1f   : > { %p2441_p1 = pnand %p2440_p12, %p2434_p6 }
  0x21   : > { %2444 = shalt.err (!%p2441_p1)
}
  0x22   : > { %s2445_s16 = scalar_lea.vmem %s2648_s29, 1024  ;;  %s2544_s17 = smov [#allocation2]  }
  0x23   : > { %p2446_p2 = scmp.ne.s32.totalorder %s2648_s29, %s2445_s16  ;;  %s2450_s22 = sshll.u32 %s2544_s17, 4  ;;  %s2451_s22 = int_to_ptr.vmem [resolvable:$false] %s2450_s22 }
  0x24   : > { %s2452_s23 = scalar_lea.vmem %s2451_s22, 2048  ;;  %p2453_p9 = scmp.lt.s32.totalorder %s2648_s29, %s2451_s22 }
  0x25   : > { %p2448_p5 = pnand %p2446_p2, %p2432_p3  ;;  %p2454_p4 = scmp.lt.s32.totalorder %s2452_s23, %s2445_s16 }
  0x27   : > { %p2449_p11 = pneg %p2448_p5  ;;  %p2455_p7 = por %p2454_p4, %p2453_p9 }
  0x29   : > { %p2456_p10 = pnand %p2455_p7, %p2449_p11 }
  0x2b   : > { %2459 = shalt.err (!%p2456_p10)
}
  0x2c   : > { %s2545_s24 = smov 128   ;;  %s2546_s25 = smov 8  }
  0x2d   : > { %2354 = dma.hbm_to_vmem [thread:$0]  (!%p2652_p0), %s2646_s27, 1024, %s2648_s29, %s2657_s2, %s2545_s24, %s2545_s24, %s2546_s25  }
  0x2e   : > { %p124_p12 = scmp.lt.s32.totalorder %s2542_s11, 3  ;;  %p3057_p1 = scmp.ge.s32.totalorder %s2542_s11, 1 }
  0x30   : > { %p125_p3 = pnand %p3057_p1, %p124_p12 }
  0x31   : > { %s2689_s26 = sand.u32 (!%p125_p3), 1, %s2526_s7  }
  0x32   : > { %128 = sbr.rel (%p125_p3) target bundleno = 569 (0x239), region = 24  ;;  %s2306_s28 = sshll.u32 (!%p125_p3), %s2689_s26, 6 }
  0x33   : > { %s131_s3 = scalar_lea.sflag (!%p125_p3), [#allocation3], %s2689_s26  ;;  %s134_s4 = scalar_lea.vmem (!%p125_p3), [#allocation2], %s2306_s28 }
  0x39   : > { %2513 = dma.done.wait (%p2624_p8), %s131_s3, 1024  }
  0x3a   : > { %2515 = vsyncadd (%p2624_p8), %s131_s3, 4294966272  ;;  %v157_v0 = vld [vmem:[%s134_s4 + $0x10] sm:$0xff]  ;;  %v155_v1 = vld [vmem:[%s134_s4] sm:$0xff]  ;;  %v2547_v8 = vmov 1983009808   ;;  %v296_v10 = vlaneseq  ;;  %v2549_v35 = vmov 0.0  }
  0x3b   : > { %195 = vxpose.xlu1.b32.start [1/2] (short) (narrow) %v157_v0, 16  ;;  %163 = vxpose.xlu0.b32.start [1/2] (short) (narrow) %v155_v1, 16  ;;  %v158_v2 = vld [vmem:[%s134_s4 + $0x18] sm:$0xff]  ;;  %v156_v3 = vld [vmem:[%s134_s4 + $0x8] sm:$0xff]  ;;  %v161_v4 = vld [vmem:[%s134_s4 + $0x30] sm:$0xff]  ;;  %v294_v9 = vunpack.c.l.s4 %v2547_v8  ;;  %s2550_s18 = smov 8  }
  0x3c   : > { %v159_v5 = vld [vmem:[%s134_s4 + $0x20] sm:$0xff]  ;;  %v162_v6 = vld [vmem:[%s134_s4 + $0x38] sm:$0xff]  ;;  %v160_v7 = vld [vmem:[%s134_s4 + $0x28] sm:$0xff]  ;;  %v297_v14 = vshrl.u32 %v296_v10, 7  ;;  %v2548_v17 = vmov 1934713408  }
  0x3d   : > { %v295_v13 = vunpack.c.0.s8 %v294_v9  ;;  %v326_v18 = vunpack.c.l.s4 %v2548_v17  ;;  %s2551_s27 = smov 4   ;;  %s2552_s29 = smov 12   ;;  %vm2147_vm0 = vcmask 31744   ;;  %vm2150_vm1 = vcmask 64512  }
  0x3e   : > { %s2553_s30 = smov 16   ;;  %s2554_s2 = smov 20   ;;  %vm2153_vm2 = vcmask 97280   ;;  %vm2156_vm3 = vcmask 130048   ;;  %vm2159_vm4 = vcmask 162816   ;;  %vm2162_vm5 = vcmask 195584  }
  0x3f   : > { %196 = vxpose.xlu1.b32.end [2/2] (short) (narrow) %v158_v2, 16  ;;  %164 = vxpose.xlu0.b32.end [2/2] (short) (narrow) %v156_v3, 16  ;;  %v2697_v19 = vsub.s32 %v295_v13, %v297_v14  ;;  %v327_v22 = vunpack.c.0.s8 %v326_v18  ;;  %s2555_s5 = smov 24   ;;  %s2556_s12 = smov 28   ;;  %vm2165_vm6 = vcmask 228352   ;;  %vm2168_vm7 = vcmask 261120  }
  0x40   : > { %s2557_s13 = smov 32   ;;  %s2558_s15 = smov 36   ;;  %vm2171_vm8 = vcmask 293888   ;;  %vm2174_vm9 = vcmask 326656   ;;  %vm2177_vm10 = vcmask 359424   ;;  %vm2180_vm11 = vcmask 392192  }
  0x41   : > { %v2701_v29 = vsub.s32 %v327_v22, %v297_v14  ;;  %s2559_s16 = smov 40   ;;  %s2560_s17 = smov 44   ;;  %vm2183_vm12 = vcmask 424960   ;;  %vm2186_vm13 = vcmask 457728   ;;  %vm2189_vm14 = vcmask 490496  }
  0x42   : > { %s2561_s22 = smov 48   ;;  %s2562_s23 = smov 52   ;;  %vm2192_vm15 = vcmask 523264  }
  0x43   : > { %259 = vxpose.xlu1.b32.start [1/2] (short) (narrow) %v161_v4, 16  ;;  %227 = vxpose.xlu0.b32.start [1/2] (short) (narrow) %v159_v5, 16  ;;  %s2563_s24 = smov 56   ;;  %s2564_s25 = smov 60  }
  0x44   : > { %s2307_s28 = sshll.u32 %s2689_s26, 4  ;;  %p3058_p9 = scmp.ne.s32.totalorder %s3054_s19, 0 }
  0x45   : > { %s152_s3 = scalar_lea.vmem [#allocation5], %s2307_s28 }
  0x46   : > { %s2211_s4 = sshll.u32 %s152_s3, 4  ;;  %s2991_s4 = int_to_ptr.vmem [resolvable:$true] %s2211_s4 }
  0x47   : > { %260 = vxpose.xlu1.b32.end [2/2] (short) (narrow) %v162_v6, 16  ;;  %228 = vxpose.xlu0.b32.end [2/2] (short) (narrow) %v160_v7, 16 }
  0xbb   : > { %v211_v11 = vpop.trf.xlu1  ;;  %v179_v12 = vpop.trf.xlu0 }
  0xbf   : > { %v212_v15 = vpop.trf.xlu1  ;;  %v180_v16 = vpop.trf.xlu0 }
  0xc3   : > { %v275_v20 = vpop.trf.xlu1  ;;  %v243_v21 = vpop.trf.xlu0 }
  0xc4   : > { %v307_v23 = vcombine.low %v211_v11, %v275_v20  ;;  %v291_v24 = vcombine.low %v179_v12, %v243_v21  ;;  %v308_v27 = vcombine.high %v211_v11, %v275_v20  ;;  %v292_v28 = vcombine.high %v179_v12, %v243_v21 }
  0xc6   : > { %v315_v25 = vrot.slane %v307_v23, %v2697_v19  ;;  %v299_v26 = vrot.slane %v291_v24, %v2697_v19  ;;  %v322_v32 = vrot.slane %v308_v27, %v2697_v19  ;;  %v306_v33 = vrot.slane %v292_v28, %v2697_v19 }
  0xc7   : > { %v276_v37 = vpop.trf.xlu1  ;;  %v244_v38 = vpop.trf.xlu0 }
  0xc8   : > { %v323_v30 = vcombine.low %v299_v26, %v315_v25  ;;  %v324_v31 = vcombine.high %v299_v26, %v315_v25  ;;  %v339_v40 = vcombine.low %v306_v33, %v322_v32  ;;  %v375_v41 = vcombine.low %v212_v15, %v276_v37 }
  0xc9   : > { %v359_v42 = vcombine.low %v180_v16, %v244_v38  ;;  %v340_v45 = vcombine.high %v306_v33, %v322_v32  ;;  %v376_v51 = vcombine.high %v212_v15, %v276_v37  ;;  %v360_v52 = vcombine.high %v180_v16, %v244_v38 }
  0xca   : > { %v331_v34 = vrot.slane %v323_v30, %v2701_v29  ;;  %v338_v39 = vrot.slane %v324_v31, %v2701_v29  ;;  %v347_v44 = vrot.slane %v339_v40, %v2701_v29  ;;  %v383_v46 = vrot.slane %v375_v41, %v2697_v19 }
  0xcb   : > { %v367_v47 = vrot.slane %v359_v42, %v2697_v19  ;;  %v354_v49 = vrot.slane %v340_v45, %v2701_v29  ;;  %v390_v56 = vrot.slane %v376_v51, %v2697_v19  ;;  %v374_v57 = vrot.slane %v360_v52, %v2697_v19 }
  0xcc   : > { %427 = vxpose.xlu0.b32.start.end [1/1] (short) (narrow) %v331_v34, 16  ;;  %v355_v36 = vcombine.high %v331_v34, %v2549_v35  ;;  %v356_v43 = vcombine.high %v338_v39, %v2549_v35  ;;  %v357_v48 = vcombine.high %v347_v44, %v2549_v35 }
  0xcd   : > { %v391_v50 = vcombine.low %v367_v47, %v383_v46  ;;  %v358_v53 = vcombine.high %v354_v49, %v2549_v35  ;;  %v392_v55 = vcombine.high %v367_v47, %v383_v46  ;;  %v407_v60 = vcombine.low %v374_v57, %v390_v56 }
  0xce   : > { %459 = vxpose.xlu1.b32.start.end [1/1] (short) (narrow) %v355_v36, 16  ;;  %v408_v63 = vcombine.high %v374_v57, %v390_v56 }
  0xcf   : > { %v399_v54 = vrot.slane %v391_v50, %v2701_v29  ;;  %v406_v59 = vrot.slane %v392_v55, %v2701_v29  ;;  %v415_v62 = vrot.slane %v407_v60, %v2701_v29 }
  0xd0   : > { %v422_v1 = vrot.slane %v408_v63, %v2701_v29 }
  0xd1   : > { %491 = vxpose.xlu0.b32.start.end [1/1] (short) (narrow) %v338_v39, 16  ;;  %v423_v58 = vcombine.high %v399_v54, %v2549_v35  ;;  %v424_v61 = vcombine.high %v406_v59, %v2549_v35  ;;  %v425_v0 = vcombine.high %v415_v62, %v2549_v35 }
  0xd2   : > { %v426_v2 = vcombine.high %v422_v1, %v2549_v35 }
  0xd3   : > { %523 = vxpose.xlu1.b32.start.end [1/1] (short) (narrow) %v356_v43, 16 }
  0xd6   : > { %555 = vxpose.xlu0.b32.start.end [1/1] (short) (narrow) %v347_v44, 16 }
  0xd8   : > { %587 = vxpose.xlu1.b32.start.end [1/1] (short) (narrow) %v357_v48, 16 }
  0xdb   : > { %619 = vxpose.xlu0.b32.start.end [1/1] (short) (narrow) %v354_v49, 16 }
  0xdd   : > { %651 = vxpose.xlu1.b32.start.end [1/1] (short) (narrow) %v358_v53, 16 }
  0xe0   : > { %683 = vxpose.xlu0.b32.start.end [1/1] (short) (narrow) %v399_v54, 16 }
  0xe2   : > { %715 = vxpose.xlu1.b32.start.end [1/1] (short) (narrow) %v423_v58, 16 }
  0xe5   : > { %747 = vxpose.xlu0.b32.start.end [1/1] (short) (narrow) %v406_v59, 16 }
  0xe7   : > { %779 = vxpose.xlu1.b32.start.end [1/1] (short) (narrow) %v424_v61, 16 }
  0xea   : > { %811 = vxpose.xlu0.b32.start.end [1/1] (short) (narrow) %v415_v62, 16 }
  0xec   : > { %843 = vxpose.xlu1.b32.start.end [1/1] (short) (narrow) %v425_v0, 16 }
  0xef   : > { %875 = vxpose.xlu0.b32.start.end [1/1] (short) (narrow) %v422_v1, 16 }
  0xf1   : > { %907 = vxpose.xlu1.b32.start.end [1/1] (short) (narrow) %v426_v2, 16 }
 0x14c   : > { %v443_v3 = vpop.trf.xlu0 }
 0x14e   : > { %v475_v4 = vpop.trf.xlu1 }
 0x150   : > { %v444_v5 = vpop.trf.xlu0 }
 0x152   : > { %v476_v6 = vpop.trf.xlu1 }
 0x154   : > { %v507_v7 = vpop.trf.xlu0 }
 0x155   : > { %v939_v8 = vcombine.low %v443_v3, %v507_v7  ;;  %v940_v9 = vcombine.high %v443_v3, %v507_v7 }
 0x156   : > { %v539_v10 = vpop.trf.xlu1 }
 0x157   : > { %v955_v11 = vcombine.low %v475_v4, %v539_v10  ;;  %v956_v12 = vcombine.high %v475_v4, %v539_v10  ;;  %v947_v14 = vrot.slane %v939_v8, %v2697_v19  ;;  %v954_v15 = vrot.slane %v940_v9, %v2697_v19 }
 0x158   : > { %v508_v13 = vpop.trf.xlu0 }
 0x159   : > { %v963_v16 = vrot.slane %v955_v11, %v2697_v19  ;;  %v970_v17 = vrot.slane %v956_v12, %v2697_v19  ;;  %v1211_v18 = vcombine.low %v444_v5, %v508_v13  ;;  %v1212_v20 = vcombine.high %v444_v5, %v508_v13 }
 0x15a   : > { %v540_v21 = vpop.trf.xlu1 }
 0x15b   : > { %v1003_v22 = vcombine.low %v947_v14, %v963_v16  ;;  %v1004_v23 = vcombine.high %v947_v14, %v963_v16  ;;  %v1019_v24 = vcombine.low %v954_v15, %v970_v17  ;;  %v1020_v25 = vcombine.high %v954_v15, %v970_v17 }
 0x15c   : > { %v1227_v26 = vcombine.low %v476_v6, %v540_v21  ;;  %v1228_v27 = vcombine.high %v476_v6, %v540_v21  ;;  %v571_v28 = vpop.trf.xlu0  ;;  %v1219_v34 = vrot.slane %v1211_v18, %v2697_v19  ;;  %v1226_v35 = vrot.slane %v1212_v20, %v2697_v19 }
 0x15d   : > { %v1011_v30 = vrot.slane %v1003_v22, %v2701_v29  ;;  %v1018_v31 = vrot.slane %v1004_v23, %v2701_v29  ;;  %v1027_v32 = vrot.slane %v1019_v24, %v2701_v29  ;;  %v1034_v33 = vrot.slane %v1020_v25, %v2701_v29 }
 0x15e   : > { %v1235_v36 = vrot.slane %v1227_v26, %v2697_v19  ;;  %v1242_v37 = vrot.slane %v1228_v27, %v2697_v19  ;;  %v603_v38 = vpop.trf.xlu1 }
 0x15f   : > { %v2308_v39 = vcombine.low %v1011_v30, %v1018_v31  ;;  %v2310_v40 = vcombine.high %v1011_v30, %v1018_v31  ;;  %v2312_v41 = vcombine.low %v1027_v32, %v1034_v33  ;;  %v2314_v42 = vcombine.high %v1027_v32, %v1034_v33 }
 0x160   : > { %v1275_v43 = vcombine.low %v1219_v34, %v1235_v36  ;;  %v1276_v44 = vcombine.high %v1219_v34, %v1235_v36  ;;  %v1291_v45 = vcombine.low %v1226_v35, %v1242_v37  ;;  %v1292_v46 = vcombine.high %v1226_v35, %v1242_v37  ;;  %v572_v47 = vpop.trf.xlu0 }
 0x161   : > { %v1491_v48 = vrot.slane %v2308_v39, %v2697_v19  ;;  %v1507_v49 = vrot.slane %v2310_v40, %v2697_v19  ;;  %v1523_v50 = vrot.slane %v2312_v41, %v2697_v19  ;;  %v1539_v51 = vrot.slane %v2314_v42, %v2697_v19 }
 0x162   : > { %v1283_v52 = vrot.slane %v1275_v43, %v2701_v29  ;;  %v1290_v53 = vrot.slane %v1276_v44, %v2701_v29  ;;  %v1299_v54 = vrot.slane %v1291_v45, %v2701_v29  ;;  %v1306_v55 = vrot.slane %v1292_v46, %v2701_v29  ;;  %v604_v56 = vpop.trf.xlu1 }
 0x163   : > { %v1548_v57 = vcombine.high %v1491_v48, %v1507_v49  ;;  %v1580_v58 = vcombine.high %v1523_v50, %v1539_v51  ;;  %v1547_v59 = vcombine.low %v1491_v48, %v1507_v49  ;;  %v1579_v60 = vcombine.low %v1523_v50, %v1539_v51 }
 0x164   : > { %v2316_v61 = vcombine.low %v1283_v52, %v1290_v53  ;;  %v2318_v62 = vcombine.high %v1283_v52, %v1290_v53  ;;  %v2320_v63 = vcombine.low %v1299_v54, %v1306_v55  ;;  %v2322_v0 = vcombine.high %v1299_v54, %v1306_v55  ;;  %v635_v1 = vpop.trf.xlu0 }
 0x165   : > { %v971_v2 = vcombine.low %v571_v28, %v635_v1  ;;  %v972_v3 = vcombine.high %v571_v28, %v635_v1  ;;  %v1562_v4 = vrot.slane %v1548_v57, %v2701_v29  ;;  %v1594_v5 = vrot.slane %v1580_v58, %v2701_v29 }
 0x166   : > { %v667_v6 = vpop.trf.xlu1  ;;  %v2740_v7 = vrot.slane %v1547_v59, %v2701_v29  ;;  %v2743_v8 = vrot.slane %v1579_v60, %v2701_v29  ;;  %v2746_v9 = vrot.slane %v2316_v61, %v2697_v19  ;;  %v2749_v10 = vrot.slane %v2318_v62, %v2697_v19 }
 0x167   : > { %v979_v11 = vrot.slane %v971_v2, %v2697_v19  ;;  %v987_v12 = vcombine.low %v603_v38, %v667_v6  ;;  %v988_v13 = vcombine.high %v603_v38, %v667_v6  ;;  %v986_v14 = vrot.slane %v972_v3, %v2697_v19 }
 0x168   : > { %v636_v15 = vpop.trf.xlu0  ;;  %v1613_v16 = vcombine.low %v1562_v4, %v1594_v5  ;;  %v1612_v17 = vcombine.high %v2740_v7, %v2743_v8  ;;  %v1614_v18 = vcombine.high %v1562_v4, %v1594_v5  ;;  %v2760_v25 = vrot.slane %v2320_v63, %v2697_v19 }
 0x169   : > { %v995_v20 = vrot.slane %v987_v12, %v2697_v19  ;;  %v1002_v21 = vrot.slane %v988_v13, %v2697_v19  ;;  %v1243_v22 = vcombine.low %v572_v47, %v636_v15  ;;  %v1244_v23 = vcombine.high %v572_v47, %v636_v15 }
 0x16a   : > { %2037 = vrot.lane.b32.xlu1 %v1613_v16, %s2550_s18  ;;  %2029 = vrot.lane.b32.xlu0 %v1612_v17, %s2551_s27  ;;  %v668_v24 = vpop.trf.xlu1  ;;  %v2763_v26 = vrot.slane %v2322_v0, %v2697_v19  ;;  %v1684_v27 = vcombine.high %v2746_v9, %v2749_v10 }
 0x16b   : > { %v1035_v28 = vcombine.low %v979_v11, %v995_v20  ;;  %v1036_v30 = vcombine.high %v979_v11, %v995_v20  ;;  %v1051_v31 = vcombine.low %v986_v14, %v1002_v21  ;;  %v1052_v32 = vcombine.high %v986_v14, %v1002_v21 }
 0x16c   : > { %v1251_v33 = vrot.slane %v1243_v22, %v2697_v19  ;;  %v1258_v34 = vrot.slane %v1244_v23, %v2697_v19  ;;  %v1259_v35 = vcombine.low %v604_v56, %v668_v24  ;;  %v1260_v36 = vcombine.high %v604_v56, %v668_v24  ;;  %v699_v37 = vpop.trf.xlu0 }
 0x16d   : > { %v1043_v38 = vrot.slane %v1035_v28, %v2701_v29  ;;  %v1050_v39 = vrot.slane %v1036_v30, %v2701_v29  ;;  %v1059_v40 = vrot.slane %v1051_v31, %v2701_v29  ;;  %v1066_v41 = vrot.slane %v1052_v32, %v2701_v29 }
 0x16e   : > { %v1267_v42 = vrot.slane %v1259_v35, %v2697_v19  ;;  %v1274_v43 = vrot.slane %v1260_v36, %v2697_v19  ;;  %2045 = vrot.lane.b32.xlu1 %v1614_v18, %s2552_s29  ;;  %v2777_v44 = vrot.slane %v1684_v27, %v2701_v29  ;;  %v1716_v45 = vcombine.high %v2760_v25, %v2763_v26  ;;  %v731_v46 = vpop.trf.xlu1 }
 0x16f   : > { %v2309_v47 = vcombine.low %v1043_v38, %v1050_v39  ;;  %v2311_v48 = vcombine.high %v1043_v38, %v1050_v39  ;;  %v2313_v49 = vcombine.low %v1059_v40, %v1066_v41  ;;  %v2315_v50 = vcombine.high %v1059_v40, %v1066_v41 }
 0x170   : > { %v1307_v51 = vcombine.low %v1251_v33, %v1267_v42  ;;  %v1308_v52 = vcombine.high %v1251_v33, %v1267_v42  ;;  %v1323_v53 = vcombine.low %v1258_v34, %v1274_v43  ;;  %v1324_v54 = vcombine.high %v1258_v34, %v1274_v43  ;;  %v700_v55 = vpop.trf.xlu0 }
 0x171   : > { %v2782_v56 = vrot.slane %v1716_v45, %v2701_v29  ;;  %v2785_v57 = vrot.slane %v2309_v47, %v2697_v19  ;;  %v2788_v58 = vrot.slane %v2311_v48, %v2697_v19  ;;  %v2791_v59 = vrot.slane %v2313_v49, %v2697_v19 }
 0x172   : > { %v1315_v60 = vrot.slane %v1307_v51, %v2701_v29  ;;  %v1322_v61 = vrot.slane %v1308_v52, %v2701_v29  ;;  %v1331_v62 = vrot.slane %v1323_v53, %v2701_v29  ;;  %v1338_v63 = vrot.slane %v1324_v54, %v2701_v29  ;;  %v732_v0 = vpop.trf.xlu1 }
 0x173   : > { %v1750_v1 = vcombine.high %v2777_v44, %v2782_v56  ;;  %v2800_v2 = vrot.slane %v2315_v50, %v2697_v19  ;;  %v1563_v3 = vcombine.low %v2785_v57, %v2788_v58  ;;  %v1564_v42 = vcombine.high %v2785_v57, %v2788_v58 }
 0x174   : > { %v2317_v4 = vcombine.low %v1315_v60, %v1322_v61  ;;  %v2319_v5 = vcombine.high %v1315_v60, %v1322_v61  ;;  %v2321_v6 = vcombine.low %v1331_v62, %v1338_v63  ;;  %v2323_v11 = vcombine.high %v1331_v62, %v1338_v63  ;;  %v763_v12 = vpop.trf.xlu0 }
 0x175   : > { %2047 = vrot.lane.b32.xlu0 %v1750_v1, %s2552_s29  ;;  %v1075_v13 = vcombine.low %v699_v37, %v763_v12  ;;  %v1076_v14 = vcombine.high %v699_v37, %v763_v12  ;;  %v1571_v15 = vrot.slane %v1563_v3, %v2701_v29  ;;  %v1595_v16 = vcombine.low %v2791_v59, %v2800_v2 }
 0x176   : > { %v795_v17 = vpop.trf.xlu1  ;;  %v2809_v18 = vrot.slane %v2317_v4, %v2697_v19  ;;  %v2812_v20 = vrot.slane %v2319_v5, %v2697_v19  ;;  %v2815_v21 = vrot.slane %v2321_v6, %v2697_v19  ;;  %v1682_v22 = vrot.slane %v2323_v11, %v2697_v19 }
 0x177   : > { %v1083_v23 = vrot.slane %v1075_v13, %v2697_v19  ;;  %v1091_v24 = vcombine.low %v731_v46, %v795_v17  ;;  %v1092_v27 = vcombine.high %v731_v46, %v795_v17  ;;  %v1090_v28 = vrot.slane %v1076_v14, %v2697_v19 }
 0x178   : > { %v764_v30 = vpop.trf.xlu0  ;;  %v1603_v31 = vrot.slane %v1595_v16, %v2701_v29  ;;  %v1699_v32 = vcombine.low %v2809_v18, %v2812_v20  ;;  %v1731_v33 = vcombine.low %v2815_v21, %v1682_v22  ;;  %v1596_v62 = vcombine.high %v2791_v59, %v2800_v2 }
 0x179   : > { %v1099_v34 = vrot.slane %v1091_v24, %v2697_v19  ;;  %v1106_v35 = vrot.slane %v1092_v27, %v2697_v19  ;;  %v1347_v36 = vcombine.low %v700_v55, %v764_v30  ;;  %v1348_v37 = vcombine.high %v700_v55, %v764_v30 }
 0x17a   : > { %v1615_v38 = vcombine.low %v1571_v15, %v1603_v31  ;;  %v796_v39 = vpop.trf.xlu1  ;;  %v1707_v40 = vrot.slane %v1699_v32, %v2701_v29  ;;  %v1739_v41 = vrot.slane %v1731_v33, %v2701_v29  ;;  %v1616_v51 = vcombine.high %v1571_v15, %v1603_v31 }
 0x17b   : > { %v1139_v43 = vcombine.low %v1083_v23, %v1099_v34  ;;  %v1140_v45 = vcombine.high %v1083_v23, %v1099_v34  ;;  %v1155_v46 = vcombine.low %v1090_v28, %v1106_v35  ;;  %v1156_v47 = vcombine.high %v1090_v28, %v1106_v35 }
 0x17c   : > { %2053 = vrot.lane.b32.xlu1 %v1615_v38, %s2553_s30  ;;  %v1363_v48 = vcombine.low %v732_v0, %v796_v39  ;;  %v1364_v49 = vcombine.high %v732_v0, %v796_v39  ;;  %v827_v50 = vpop.trf.xlu0  ;;  %v1355_v54 = vrot.slane %v1347_v36, %v2697_v19  ;;  %v1362_v55 = vrot.slane %v1348_v37, %v2697_v19 }
 0x17d   : > { %v2831_v52 = vrot.slane %v1139_v43, %v2701_v29  ;;  %v2834_v53 = vrot.slane %v1140_v45, %v2701_v29  ;;  %v1751_v60 = vcombine.low %v1707_v40, %v1739_v41  ;;  %v2843_v63 = vrot.slane %v1155_v46, %v2701_v29 }
 0x17e   : > { %v1371_v57 = vrot.slane %v1363_v48, %v2697_v19  ;;  %v1378_v58 = vrot.slane %v1364_v49, %v2697_v19  ;;  %v859_v61 = vpop.trf.xlu1  ;;  %v2846_v0 = vrot.slane %v1156_v47, %v2701_v29  ;;  %v1578_v1 = vrot.slane %v1564_v42, %v2701_v29 }
 0x17f   : > { %v1683_v3 = vcombine.low %v2746_v9, %v2749_v10  ;;  %v2324_v59 = vcombine.low %v2831_v52, %v2834_v53  ;;  %2055 = vrot.lane.b32.xlu0 %v1751_v60, %s2553_s30  ;;  %v1610_v2 = vrot.slane %v1596_v62, %v2701_v29  ;;  %v1700_v13 = vcombine.high %v2809_v18, %v2812_v20 }
 0x180   : > { %v1411_v4 = vcombine.low %v1355_v54, %v1371_v57  ;;  %v1412_v5 = vcombine.high %v1355_v54, %v1371_v57  ;;  %v1427_v6 = vcombine.low %v1362_v55, %v1378_v58  ;;  %v1428_v11 = vcombine.high %v1362_v55, %v1378_v58  ;;  %2061 = vrot.lane.b32.xlu1 %v1616_v51, %s2554_s2  ;;  %v828_v12 = vpop.trf.xlu0 }
 0x181   : > { %v1732_v14 = vcombine.high %v2815_v21, %v1682_v22  ;;  %v1617_v23 = vcombine.low %v1578_v1, %v1610_v2  ;;  %v1752_v24 = vcombine.high %v1707_v40, %v1739_v41  ;;  %v1714_v27 = vrot.slane %v1700_v13, %v2701_v29 }
 0x182   : > { %v1419_v9 = vrot.slane %v1411_v4, %v2701_v29  ;;  %v1426_v10 = vrot.slane %v1412_v5, %v2701_v29  ;;  %v1435_v15 = vrot.slane %v1427_v6, %v2701_v29  ;;  %v1442_v16 = vrot.slane %v1428_v11, %v2701_v29  ;;  %v860_v17 = vpop.trf.xlu1 }
 0x183   : > { %v1746_v28 = vrot.slane %v1732_v14, %v2701_v29  ;;  %v2326_v18 = vcombine.high %v2831_v52, %v2834_v53  ;;  %2063 = vrot.lane.b32.xlu0 %v1752_v24, %s2554_s2  ;;  %v1618_v33 = vcombine.high %v1578_v1, %v1610_v2  ;;  %v2866_v37 = vrot.slane %v1683_v3, %v2701_v29 }
 0x184   : > { %v2332_v20 = vcombine.low %v1419_v9, %v1426_v10  ;;  %v2334_v21 = vcombine.high %v1419_v9, %v1426_v10  ;;  %v2336_v22 = vcombine.low %v1435_v15, %v1442_v16  ;;  %v891_v30 = vpop.trf.xlu0  ;;  %2069 = vrot.lane.b32.xlu1 %v1617_v23, %s2555_s5  ;;  %v2338_v34 = vcombine.high %v1435_v15, %v1442_v16 }
 0x185   : > { %v1107_v31 = vcombine.low %v827_v50, %v891_v30  ;;  %v1108_v32 = vcombine.high %v827_v50, %v891_v30  ;;  %v1753_v35 = vcombine.low %v1714_v27, %v1746_v28  ;;  %v1715_v38 = vcombine.low %v2760_v25, %v2763_v26 }
 0x186   : > { %v923_v36 = vpop.trf.xlu1  ;;  %v2876_v46 = vrot.slane %v2332_v20, %v2697_v19  ;;  %v2879_v47 = vrot.slane %v2334_v21, %v2697_v19  ;;  %v2882_v48 = vrot.slane %v2336_v22, %v2697_v19  ;;  %v1947_v55 = vrot.slane %v2338_v34, %v2697_v19 }
 0x187   : > { %v1115_v39 = vrot.slane %v1107_v31, %v2697_v19  ;;  %v1122_v40 = vrot.slane %v1108_v32, %v2697_v19  ;;  %v1123_v41 = vcombine.low %v859_v61, %v923_v36  ;;  %v1124_v42 = vcombine.high %v859_v61, %v923_v36  ;;  %2071 = vrot.lane.b32.xlu0 %v1753_v35, %s2555_s5  ;;  %s2460_s5 = scalar_lea.vmem %s2991_s4, 256 }
 0x188   : > { %v892_v43 = vpop.trf.xlu0  ;;  %v2873_v45 = vrot.slane %v1715_v38, %v2701_v29  ;;  %2077 = vrot.lane.b32.xlu1 %v1618_v33, %s2556_s12  ;;  %v1955_v57 = vcombine.low %v2876_v46, %v2879_v47  ;;  %v2328_v1 = vcombine.low %v2843_v63, %v2846_v0  ;;  %v1754_v3 = vcombine.high %v1714_v27, %v1746_v28  ;;  %p2461_p8 = scmp.ne.s32.totalorder %s2991_s4, %s2460_s5 }
 0x189   : > { %v1131_v25 = vrot.slane %v1123_v41, %v2697_v19  ;;  %v1138_v26 = vrot.slane %v1124_v42, %v2697_v19  ;;  %v1379_v49 = vcombine.low %v828_v12, %v892_v43  ;;  %v1380_v50 = vcombine.high %v828_v12, %v892_v43 }
 0x18a   : > { %v1748_v51 = vcombine.high %v2866_v37, %v2873_v45  ;;  %v924_v54 = vpop.trf.xlu1  ;;  %v2330_v6 = vcombine.high %v2843_v63, %v2846_v0  ;;  %v1749_v2 = vcombine.low %v2777_v44, %v2782_v56  ;;  %v1987_v10 = vcombine.low %v2882_v48, %v1947_v55  ;;  %p2462_p11 = pnand %p2461_p8, %p3058_p9 }
 0x18b   : > { %v1171_v58 = vcombine.low %v1115_v39, %v1131_v25  ;;  %v1172_v60 = vcombine.high %v1115_v39, %v1131_v25  ;;  %v1187_v61 = vcombine.low %v1122_v40, %v1138_v26  ;;  %v1188_v62 = vcombine.high %v1122_v40, %v1138_v26  ;;  %2079 = vrot.lane.b32.xlu0 %v1754_v3, %s2556_s12  ;;  %s2565_s12 = smov [#allocation5]  }
 0x18c   : > { %v1395_v4 = vcombine.low %v860_v17, %v924_v54  ;;  %v1396_v5 = vcombine.high %v860_v17, %v924_v54  ;;  %v1387_v11 = vrot.slane %v1379_v49, %v2697_v19  ;;  %v1394_v12 = vrot.slane %v1380_v50, %v2697_v19  ;;  %2031 = vrot.lane.b32.xlu1 %v1748_v51, %s2551_s27  ;;  %s2346_s27 = sshll.u32 %s2534_s9, 8  ;;  %s2196_s9 = scalar_lea.sflag [#allocation4], %s2689_s26 }
 0x18d   : > { %v2901_v13 = vrot.slane %v1171_v58, %v2701_v29  ;;  %v1186_v63 = vrot.slane %v1172_v60, %v2701_v29  ;;  %v1195_v0 = vrot.slane %v1187_v61, %v2701_v29  ;;  %v1202_v15 = vrot.slane %v1188_v62, %v2701_v29  ;;  %s2997_s2 = scalar_lea.hbm %s3050_s1, %s2346_s27  ;;  %p2463_p0 = pneg %p2462_p11 }
 0x18e   : > { %v1403_v14 = vrot.slane %v1395_v4, %v2697_v19  ;;  %v1410_v9 = vrot.slane %v1396_v5, %v2697_v19  ;;  %v1963_v16 = vrot.slane %v1955_v57, %v2701_v29  ;;  %v1995_v24 = vrot.slane %v1987_v10, %v2701_v29 }
 0x18f   : > { %v1763_v27 = vrot.slane %v2324_v59, %v2697_v19  ;;  %v1779_v28 = vrot.slane %v2326_v18, %v2697_v19  ;;  %v1795_v20 = vrot.slane %v2328_v1, %v2697_v19  ;;  %v1811_v33 = vrot.slane %v2330_v6, %v2697_v19 }
 0x190   : > { %v1443_v17 = vcombine.low %v1387_v11, %v1403_v14  ;;  %v1444_v44 = vcombine.high %v1387_v11, %v1403_v14  ;;  %v1459_v56 = vcombine.low %v1394_v12, %v1410_v9  ;;  %v1460_v23 = vcombine.high %v1394_v12, %v1410_v9  ;;  %2039 = vrot.lane.b32.xlu1 %v1749_v2, %s2550_s18 }
 0x191   : > { %v2019_v32 = vcombine.low %v1963_v16, %v1995_v24  ;;  %v1819_v34 = vcombine.low %v1763_v27, %v1779_v28  ;;  %v2020_v59 = vcombine.high %v1963_v16, %v1995_v24  ;;  %v1851_v18 = vcombine.low %v1795_v20, %v1811_v33 }
 0x192   : > { %v1451_v21 = vrot.slane %v1443_v17, %v2701_v29  ;;  %v1458_v22 = vrot.slane %v1444_v44, %v2701_v29  ;;  %v1467_v30 = vrot.slane %v1459_v56, %v2701_v29  ;;  %v1474_v31 = vrot.slane %v1460_v23, %v2701_v29 }
 0x193   : > { %2087 = vrot.lane.b32.xlu0 %v2019_v32, %s2557_s13  ;;  %v1827_v53 = vrot.slane %v1819_v34, %v2701_v29  ;;  %v1956_v39 = vcombine.high %v2876_v46, %v2879_v47  ;;  %v1988_v40 = vcombine.high %v2882_v48, %v1947_v55  ;;  %v1820_v41 = vcombine.high %v1763_v27, %v1779_v28 }
 0x194   : > { %v2333_v35 = vcombine.low %v1451_v21, %v1458_v22  ;;  %v2335_v36 = vcombine.high %v1451_v21, %v1458_v22  ;;  %v2337_v38 = vcombine.low %v1467_v30, %v1474_v31  ;;  %v2339_v52 = vcombine.high %v1467_v30, %v1474_v31 }
 0x195   : > { %v1852_v42 = vcombine.high %v1795_v20, %v1811_v33  ;;  %v1859_v26 = vrot.slane %v1851_v18, %v2701_v29  ;;  %v1970_v49 = vrot.slane %v1956_v39, %v2701_v29  ;;  %v2002_v50 = vrot.slane %v1988_v40, %v2701_v29 }
 0x196   : > { %v1906_v43 = vrot.slane %v2333_v35, %v2697_v19  ;;  %v1922_v25 = vrot.slane %v2335_v36, %v2697_v19  ;;  %v1938_v51 = vrot.slane %v2337_v38, %v2697_v19  ;;  %v2325_v54 = vcombine.low %v2901_v13, %v1186_v63 }
 0x197   : > { %v1954_v46 = vrot.slane %v2339_v52, %v2697_v19  ;;  %v2327_v48 = vcombine.high %v2901_v13, %v1186_v63  ;;  %v2329_v55 = vcombine.low %v1195_v0, %v1202_v15  ;;  %v2331_v57 = vcombine.high %v1195_v0, %v1202_v15  ;;  %2095 = vrot.lane.b32.xlu0 %v2020_v59, %s2558_s15 }
 0x198   : > { %v1971_v47 = vcombine.low %v1906_v43, %v1922_v25  ;;  %v1883_v58 = vcombine.low %v1827_v53, %v1859_v26  ;;  %v2021_v61 = vcombine.low %v1970_v49, %v2002_v50  ;;  %v1834_v62 = vrot.slane %v1820_v41, %v2701_v29 }
 0x199   : > { %v2003_v60 = vcombine.low %v1938_v51, %v1954_v46  ;;  %v1866_v1 = vrot.slane %v1852_v42, %v2701_v29  ;;  %v1884_v3 = vcombine.high %v1827_v53, %v1859_v26  ;;  %v1770_v5 = vrot.slane %v2325_v54, %v2697_v19 }
 0x19a   : > { %2085 = vrot.lane.b32.xlu1 %v1883_v58, %s2557_s13  ;;  %v1979_v4 = vrot.slane %v1971_v47, %v2701_v29  ;;  %v1611_v6 = vcombine.low %v2740_v7, %v2743_v8  ;;  %v1786_v12 = vrot.slane %v2327_v48, %v2697_v19  ;;  %v1802_v2 = vrot.slane %v2329_v55, %v2697_v19  ;;  %s2464_s13 = sshll.u32 %s2565_s12, 4  ;;  %s2465_s13 = int_to_ptr.vmem [resolvable:$false] %s2464_s13 }
 0x19b   : > { %2103 = vrot.lane.b32.xlu0 %v2021_v61, %s2559_s16  ;;  %v2011_v11 = vrot.slane %v2003_v60, %v2701_v29  ;;  %v1818_v13 = vrot.slane %v2331_v57, %v2697_v19  ;;  %v2022_v14 = vcombine.high %v1970_v49, %v2002_v50  ;;  %v1885_v9 = vcombine.low %v1834_v62, %v1866_v1  ;;  %p2467_p6 = scmp.lt.s32.totalorder %s2991_s4, %s2465_s13 }
 0x19c   : > { %v1835_v63 = vcombine.low %v1770_v5, %v1786_v12  ;;  %v1747_v15 = vcombine.low %v2866_v37, %v2873_v45  ;;  %v1972_v16 = vcombine.high %v1906_v43, %v1922_v25  ;;  %v2004_v17 = vcombine.high %v1938_v51, %v1954_v46 }
 0x19d   : > { %v2023_v10 = vcombine.low %v1979_v4, %v2011_v11  ;;  %v1867_v0 = vcombine.low %v1802_v2, %v1818_v13  ;;  %v1886_v44 = vcombine.high %v1834_v62, %v1866_v1  ;;  %v2024_v23 = vcombine.high %v1979_v4, %v2011_v11 }
 0x19e   : > { %2093 = vrot.lane.b32.xlu1 %v1884_v3, %s2558_s15  ;;  %v1843_v56 = vrot.slane %v1835_v63, %v2701_v29  ;;  %v1986_v24 = vrot.slane %v1972_v16, %v2701_v29  ;;  %v2018_v27 = vrot.slane %v2004_v17, %v2701_v29  ;;  %v1836_v37 = vcombine.high %v1770_v5, %v1786_v12  ;;  %s2466_s15 = scalar_lea.vmem %s2465_s13, 512 }
 0x19f   : > { %2111 = vrot.lane.b32.xlu0 %v2022_v14, %s2560_s17  ;;  %v1875_v19 = vrot.slane %v1867_v0, %v2701_v29  ;;  %v1868_v45 = vcombine.high %v1802_v2, %v1818_v13  ;;  %p2468_p13 = scmp.lt.s32.totalorder %s2466_s15, %s2460_s5 }
 0x1a0   : > { %v2025_v20 = vcombine.low %v1986_v24, %v2018_v27  ;;  %v1850_v22 = vrot.slane %v1836_v37, %v2701_v29  ;;  %v2026_v31 = vcombine.high %v1986_v24, %v2018_v27 }
 0x1a1   : > { %v1887_v28 = vcombine.low %v1843_v56, %v1875_v19  ;;  %v1888_v21 = vcombine.high %v1843_v56, %v1875_v19  ;;  %v1882_v30 = vrot.slane %v1868_v45, %v2701_v29  ;;  %p2469_p2 = por %p2468_p13, %p2467_p6 }
 0x1a2   : > { %2101 = vrot.lane.b32.xlu1 %v1885_v9, %s2559_s16 }
 0x1a3   : > { %2119 = vrot.lane.b32.xlu0 %v2023_v10, %s2561_s22  ;;  %v1889_v32 = vcombine.low %v1850_v22, %v1882_v30  ;;  %v1890_v33 = vcombine.high %v1850_v22, %v1882_v30  ;;  %p2470_p5 = pnand %p2469_p2, %p2463_p0 }
 0x1a6   : > { %2109 = vrot.lane.b32.xlu1 %v1886_v44, %s2560_s17 }
 0x1a7   : > { %2127 = vrot.lane.b32.xlu0 %v2024_v23, %s2562_s23 }
 0x1aa   : > { %2117 = vrot.lane.b32.xlu1 %v1887_v28, %s2561_s22 }
 0x1ab   : > { %2135 = vrot.lane.b32.xlu0 %v2025_v20, %s2563_s24 }
 0x1ae   : > { %2125 = vrot.lane.b32.xlu1 %v1888_v21, %s2562_s23 }
 0x1af   : > { %2143 = vrot.lane.b32.xlu0 %v2026_v31, %s2564_s25 }
 0x1b2   : > { %2133 = vrot.lane.b32.xlu1 %v1889_v32, %s2563_s24 }
 0x1b6   : > { %2141 = vrot.lane.b32.xlu1 %v1890_v33, %s2564_s25 }
 0x1dc   : > { %v2038_v34 = vpop.permute.xlu1 %2037  ;;  %v2030_v59 = vpop.permute.xlu0 %2029 }
 0x1dd   : > { %v2148_v4 = vsel %vm2147_vm0, %v1611_v6, %v2030_v59 }
 0x1de   : > { %v2151_v12 = vsel %vm2150_vm1, %v2148_v4, %v2038_v34 }
 0x1e0   : > { %v2046_v35 = vpop.permute.xlu1 %2045 }
 0x1e1   : > { %v2154_v13 = vsel %vm2153_vm2, %v2151_v12, %v2046_v35 }
 0x1e7   : > { %v2048_v38 = vpop.permute.xlu0 %2047 }
 0x1ee   : > { %v2054_v36 = vpop.permute.xlu1 %2053 }
 0x1ef   : > { %v2157_v14 = vsel %vm2156_vm3, %v2154_v13, %v2054_v36 }
 0x1f1   : > { %v2056_v53 = vpop.permute.xlu0 %2055 }
 0x1f2   : > { %v2062_v52 = vpop.permute.xlu1 %2061 }
 0x1f3   : > { %v2160_v7 = vsel %vm2159_vm4, %v2157_v14, %v2062_v52 }
 0x1f5   : > { %v2064_v39 = vpop.permute.xlu0 %2063 }
 0x1f6   : > { %v2070_v18 = vpop.permute.xlu1 %2069 }
 0x1f7   : > { %v2163_v6 = vsel %vm2162_vm5, %v2160_v7, %v2070_v18 }
 0x1f9   : > { %v2072_v41 = vpop.permute.xlu0 %2071 }
 0x1fa   : > { %v2078_v40 = vpop.permute.xlu1 %2077 }
 0x1fd   : > { %v2080_v42 = vpop.permute.xlu0 %2079 }
 0x1fe   : > { %v2032_v29 = vpop.permute.xlu1 %2031 }
 0x1ff   : > { %v2149_v25 = vsel %vm2147_vm0, %v1747_v15, %v2032_v29  ;;  %v2166_v15 = vsel %vm2165_vm6, %v2163_v6, %v2078_v40 }
 0x202   : > { %v2040_v43 = vpop.permute.xlu1 %2039 }
 0x203   : > { %v2152_v26 = vsel %vm2150_vm1, %v2149_v25, %v2040_v43 }
 0x204   : > { %v2155_v50 = vsel %vm2153_vm2, %v2152_v26, %v2048_v38 }
 0x205   : > { %v2088_v49 = vpop.permute.xlu0 %2087  ;;  %v2158_v54 = vsel %vm2156_vm3, %v2155_v50, %v2056_v53 }
 0x206   : > { %v2161_v48 = vsel %vm2159_vm4, %v2158_v54, %v2064_v39 }
 0x207   : > { %v2164_v57 = vsel %vm2162_vm5, %v2161_v48, %v2072_v41 }
 0x208   : > { %v2167_v61 = vsel %vm2165_vm6, %v2164_v57, %v2080_v42 }
 0x209   : > { %v2096_v51 = vpop.permute.xlu0 %2095  ;;  %v2170_v1 = vsel %vm2168_vm7, %v2167_v61, %v2088_v49 }
 0x20a   : > { %v2173_v11 = vsel %vm2171_vm8, %v2170_v1, %v2096_v51 }
 0x20c   : > { %v2086_v46 = vpop.permute.xlu1 %2085 }
 0x20d   : > { %v2104_v47 = vpop.permute.xlu0 %2103  ;;  %v2169_v17 = vsel %vm2168_vm7, %v2166_v15, %v2086_v46 }
 0x20e   : > { %v2176_v9 = vsel %vm2174_vm9, %v2173_v11, %v2104_v47 }
 0x210   : > { %v2094_v55 = vpop.permute.xlu1 %2093 }
 0x211   : > { %v2112_v58 = vpop.permute.xlu0 %2111  ;;  %v2172_v19 = vsel %vm2171_vm8, %v2169_v17, %v2094_v55 }
 0x212   : > { %v2179_v8 = vsel %vm2177_vm10, %v2176_v9, %v2112_v58 }
 0x214   : > { %v2102_v60 = vpop.permute.xlu1 %2101 }
 0x215   : > { %v2120_v62 = vpop.permute.xlu0 %2119  ;;  %v2175_v24 = vsel %vm2174_vm9, %v2172_v19, %v2102_v60 }
 0x216   : > { %v2182_v63 = vsel %vm2180_vm11, %v2179_v8, %v2120_v62 }
 0x218   : > { %v2110_v3 = vpop.permute.xlu1 %2109 }
 0x219   : > { %v2128_v5 = vpop.permute.xlu0 %2127  ;;  %v2178_v28 = vsel %vm2177_vm10, %v2175_v24, %v2110_v3 }
 0x21a   : > { %v2185_v16 = vsel %vm2183_vm12, %v2182_v63, %v2128_v5 }
 0x21c   : > { %v2118_v2 = vpop.permute.xlu1 %2117 }
 0x21d   : > { %v2136_v10 = vpop.permute.xlu0 %2135  ;;  %v2181_v37 = vsel %vm2180_vm11, %v2178_v28, %v2118_v2 }
 0x21e   : > { %v2188_v44 = vsel %vm2186_vm13, %v2185_v16, %v2136_v10 }
 0x220   : > { %v2126_v0 = vpop.permute.xlu1 %2125 }
 0x221   : > { %v2144_v56 = vpop.permute.xlu0 %2143  ;;  %v2184_v45 = vsel %vm2183_vm12, %v2181_v37, %v2126_v0 }
 0x222   : > { %v2191_v23 = vsel %vm2189_vm14, %v2188_v44, %v2144_v56 }
 0x223   : > { %2194 = vst.msk [vmem:[%s152_s3 + $0x8] sm:$0xff] %vm2192_vm15, %v2191_v23 }
 0x224   : > { %v2134_v27 = vpop.permute.xlu1 %2133 }
 0x225   : > { %v2187_v20 = vsel %vm2186_vm13, %v2184_v45, %v2134_v27 }
 0x228   : > { %v2142_v21 = vpop.permute.xlu1 %2141 }
 0x229   : > { %v2190_v22 = vsel %vm2189_vm14, %v2187_v20, %v2142_v21 }
 0x22a   : > { %2193 = vst.msk [vmem:[%s152_s3] sm:$0xff] %vm2192_vm15, %v2190_v22 }
 0x22b   : > { %2473 = shalt.err (!%p2470_p5)
}
 0x22c   : > { %s2474_s16 = scalar_lea.hbm %s2997_s2, 256  ;;  %s2478_s23 = scalar_lea.hbm %s3050_s1, 512 }
 0x22d   : > { %p2475_p4 = scmp.ne.s32.totalorder %s2997_s2, %s2474_s16  ;;  %p2479_p12 = scmp.lt.u32.totalorder %s2997_s2, %s3050_s1 }
 0x22e   : > { %p2480_p1 = scmp.lt.u32.totalorder %s2478_s23, %s2474_s16  ;;  %p2482_p8 = scmp.lt.u32.totalorder %s2474_s16, %s2997_s2 }
 0x22f   : > { %p2476_p7 = pnand %p2475_p4, %p3058_p9 }
 0x230   : > { %p2481_p3 = por %p2480_p1, %p2479_p12 }
 0x231   : > { %p2477_p10 = pneg %p2476_p7 }
 0x232   : > { %p2483_p11 = por %p2482_p8, %p2481_p3 }
 0x234   : > { %p2484_p0 = pnand %p2483_p11, %p2477_p10 }
 0x236   : > { %2487 = shalt.err (!%p2484_p0)
}
 0x237   : > { %s2566_s28 = smov 128  }
 0x238   : > { %2349 = dma.vmem_to_hbm [thread:$0]  (%p3058_p9), %s2991_s4, 256, %s2997_s2, %s2196_s9, %s2566_s28, %s2566_s28, %s2550_s18  }
 0x239 PF: > { %s2226_s3 = sand.u32 1, %s2522_s6   ;;  %p3059_p6 = scmp.ne.s32.totalorder %s3055_s21, 0 }
 0x23a   : > { %p3060_p13 = scmp.ge.s32.totalorder %s2542_s11, 2  ;;  %s2227_s27 = scalar_lea.sflag [#allocation4], %s2226_s3 }
 0x23c   : > { %p2356_p2 = pnand %p3060_p13, %p3059_p6 }
 0x23e   : > { %2517 = dma.done.wait (!%p2356_p2), %s2227_s27, 256  }
 0x23f   : > { %2519 = vsyncadd (!%p2356_p2), %s2227_s27, 4294967040  ;;  %s17_s11 = sadd.s32 1, %s2542_s11   ;;  %s3061_s6 = smov %s2526_s7 }
 0x240   : > { %p14_p5 = scmp.ge.s32.totalorder %s17_s11, 4   ;;  %s3062_s7 = smov %s2530_s8 }
 0x241   : > { %s3063_s8 = smov %s2633_s20  ;;  %s3064_s9 = smov %s2538_s10 }
 0x242   : > { %s3065_s10 = smov %s3067_s14  ;;  %16 = sbr.rel (!%p14_p5) target bundleno = 6 (0x6), region = 69 }
 0x249   :  { %2232 = vsyncpa [#allocation3], 1 }
 0x24a   :  { %2234 = vsyncpa [#allocation3 + $0x1], 1 }
 0x24b   :  { %2235 = vsyncpa [#allocation4], 1 }
 0x24c   :  { %2237 = vsyncpa [#allocation4 + $0x1], 1 }

// kernel: tpu_custom_call.1
= control target key start
LH: loop header
LB: loop body
LE: loop exit
PB: predicated region body
PF: predicated region fallthrough
CT: control target
= control target key end

     0   :  { %6 = vsyncpa [#allocation3], 0  ;;  %s2093_s0 = inlined_call_operand.hbm [shape: f32[2,4,16,16], index: 0, kind: input, shape index: {}]   ;;  %s2094_s1 = inlined_call_operand.vmem [shape: f32[2,16,16,4], index: 1, kind: output, shape index: {}]  }
   0x1   :  { %8 = vsyncpa [#allocation3 + $0x1], 0  ;;  %s1802_s6 = smov 0   ;;  %s1804_s7 = smov 0  }
   0x2   :  { %s1806_s8 = smov 0   ;;  %s1808_s9 = smov 0  }
   0x3   :  { %s1810_s10 = smov 0   ;;  %s1812_s11 = smov 0  }
   0x4 LB: > { %s1629_s12 = sadd.s32 4294967295, %s1784_s11   ;;  %s26_s13 = sadd.s32 1, %s1780_s10  ;;  %s1784_s11 = sphi %s1812_s11, %s14_s11   ;;  %s1780_s10 = sphi %s1810_s10, %s2102_s10   ;;  %s1776_s9 = sphi %s1808_s9, %s2101_s9   ;;  %s1772_s8 = sphi %s1806_s8, %s2100_s8   ;;  %s1768_s7 = sphi %s1804_s7, %s2099_s7   ;;  %s1764_s6 = sphi %s1802_s6, %s2098_s6  }
   0x5   : > { %p28_p0 = scmp.ge.s32.totalorder %s26_s13, 2  ;;  %s35_s14 = sadd.s32 1, %s1772_s8 }
   0x6   : > { %p42_p1 = scmp.ne.s32.totalorder %s1772_s8, %s1768_s7  ;;  %p43_p2 = scmp.eq.s32.totalorder %s1784_s11, 0 }
   0x7   : > { %s2104_s13 = smov (%p28_p0, %s26_s13), 0  ;;  %p48_p4 = scmp.ne.s32.totalorder %s1768_s7, %s1764_s6 }
   0x8   : > { %p1838_p3 = por %p43_p2, %p42_p1  ;;  %s30_s16 = ssub.s32 %s1780_s10, %s2104_s13 }
   0x9   : > { %p49_p5 = scmp.eq.s32.totalorder %s1629_s12, 0  ;;  %p33_p6 = scmp.eq.s32.totalorder %s30_s16, 0 }
   0xa   : > { %p1650_p8 = scmp.lt.s32.totalorder %s1784_s11, 2  ;;  %s100_s19 = sand.u32 1, %s1772_s8  }
   0xb   : > { %p1845_p7 = por %p49_p5, %p48_p4  ;;  %s1642_s20 = sshll.u32 %s1780_s10, 10 }
   0xc   : > { %s1851_s18 = scalar_select %p33_p6, %s1772_s8, %s35_s14  }
   0xd   : > { %s1633_s21 = sshll.u32 %s100_s19, 6  ;;  %s1858_s24 = scalar_lea.hbm %s2093_s0, %s1642_s20 }
   0xe   : > { %s104_s25 = scalar_lea.vmem [#allocation2], %s1633_s21  ;;  %p1862_p9 = pnand %p1650_p8, %p1838_p3 }
   0xf   : > { %s113_s26 = sshll.u32 %s104_s25, 4  ;;  %s1868_s28 = scalar_lea.sflag [#allocation3], %s100_s19  ;;  %s1866_s26 = int_to_ptr.vmem [resolvable:$true] %s113_s26 }
  0x10   : > { %s1704_s29 = scalar_lea.hbm %s1858_s24, 1024  ;;  %p1706_p11 = pneg %p1862_p9 }
  0x11   : > { %p1705_p10 = scmp.ne.s32.totalorder %s1858_s24, %s1704_s29  ;;  %s1709_s3 = scalar_lea.hbm %s2093_s0, 2048 }
  0x12   : > { %p1710_p0 = scmp.lt.u32.totalorder %s1858_s24, %s2093_s0  ;;  %p1711_p1 = scmp.lt.u32.totalorder %s1709_s3, %s1704_s29 }
  0x13   : > { %p1707_p12 = pnand %p1706_p11, %p1705_p10  ;;  %p1713_p3 = scmp.lt.u32.totalorder %s1704_s29, %s1858_s24 }
  0x14   : > { %p1712_p2 = por %p1711_p1, %p1710_p0 }
  0x15   : > { %p1708_p13 = pneg %p1707_p12 }
  0x16   : > { %p1714_p4 = por %p1713_p3, %p1712_p2 }
  0x18   : > { %p1715_p5 = pnand %p1714_p4, %p1708_p13 }
  0x1a   : > { %1718 = shalt.err (!%p1715_p5)
}
  0x1b   : > { %s1719_s6 = scalar_lea.vmem %s1866_s26, 1024  ;;  %s1786_s12 = smov [#allocation2]  }
  0x1c   : > { %p1720_p6 = scmp.ne.s32.totalorder %s1866_s26, %s1719_s6  ;;  %s1724_s14 = sshll.u32 %s1786_s12, 4  ;;  %s1725_s14 = int_to_ptr.vmem [resolvable:$false] %s1724_s14 }
  0x1d   : > { %s1726_s15 = scalar_lea.vmem %s1725_s14, 2048  ;;  %p1727_p12 = scmp.lt.s32.totalorder %s1866_s26, %s1725_s14 }
  0x1e   : > { %p1722_p8 = pnand %p1720_p6, %p1706_p11  ;;  %p1728_p0 = scmp.lt.s32.totalorder %s1726_s15, %s1719_s6 }
  0x20   : > { %p1723_p10 = pneg %p1722_p8  ;;  %p1729_p1 = por %p1728_p0, %p1727_p12 }
  0x22   : > { %p1730_p2 = pnand %p1729_p1, %p1723_p10 }
  0x24   : > { %1733 = shalt.err (!%p1730_p2)
}
  0x25   : > { %s1787_s16 = smov 128   ;;  %s1788_s19 = smov 8  }
  0x26   : > { %1649 = dma.hbm_to_vmem [thread:$0]  (!%p1862_p9), %s1858_s24, 1024, %s1866_s26, %s1868_s28, %s1787_s16, %s1787_s16, %s1788_s19  }
  0x27   : > { %p1636_p11 = scmp.ge.s32.totalorder %s1784_s11, 1  ;;  %p121_p13 = scmp.lt.s32.totalorder %s1784_s11, 3 }
  0x29   : > { %p122_p3 = pnand %p1636_p11, %p121_p13 }
  0x2a   : > { %s127_s20 = sand.u32 (!%p122_p3), 1, %s1768_s7  }
  0x2b   : > { %125 = sbr.rel (%p122_p3) target bundleno = 404 (0x194), region = 24  ;;  %s1637_s21 = sshll.u32 (!%p122_p3), %s127_s20, 6 }
  0x2c   : > { %s128_s22 = scalar_lea.sflag (!%p122_p3), [#allocation3], %s127_s20  ;;  %s131_s23 = scalar_lea.vmem (!%p122_p3), [#allocation2], %s1637_s21 }
  0x32   : > { %1759 = dma.done.wait (%p1845_p7), %s128_s22, 1024  }
  0x33   : > { %1761 = vsyncadd (%p1845_p7), %s128_s22, 4294966272  ;;  %v169_v0 = vld [vmem:[%s131_s23 + $0x10] sm:$0xff]  ;;  %v167_v1 = vld [vmem:[%s131_s23] sm:$0xff]  ;;  %v1789_v8 = vmov 1983009808   ;;  %v308_v10 = vlaneseq  ;;  %v1791_v35 = vmov 0.0  }
  0x34   : > { %207 = vxpose.xlu1.b32.start [1/2] (short) (narrow) %v169_v0, 16  ;;  %175 = vxpose.xlu0.b32.start [1/2] (short) (narrow) %v167_v1, 16  ;;  %v170_v2 = vld [vmem:[%s131_s23 + $0x18] sm:$0xff]  ;;  %v168_v3 = vld [vmem:[%s131_s23 + $0x8] sm:$0xff]  ;;  %v173_v4 = vld [vmem:[%s131_s23 + $0x30] sm:$0xff]  ;;  %v306_v9 = vunpack.c.l.s4 %v1789_v8  ;;  %p157_p7 = scmp.lt.s32.totalorder %s1776_s9, 1 }
  0x35   : > { %v171_v5 = vld [vmem:[%s131_s23 + $0x20] sm:$0xff]  ;;  %v174_v6 = vld [vmem:[%s131_s23 + $0x38] sm:$0xff]  ;;  %v172_v7 = vld [vmem:[%s131_s23 + $0x28] sm:$0xff]  ;;  %v309_v14 = vshrl.u32 %v308_v10, 7  ;;  %v1790_v17 = vmov 1934713408  }
  0x36   : > { %v307_v13 = vunpack.c.0.s8 %v306_v9  ;;  %v338_v18 = vunpack.c.l.s4 %v1790_v17  ;;  %vm1495_vm0 = vcmask 31744   ;;  %s2106_s9 = smov (!%p157_p7, %s1776_s9), 1 }
  0x37   : > { %s1643_s17 = sshll.u32 %s2106_s9, 8 }
  0x38   : > { %208 = vxpose.xlu1.b32.end [2/2] (short) (narrow) %v170_v2, 16  ;;  %176 = vxpose.xlu0.b32.end [2/2] (short) (narrow) %v168_v3, 16  ;;  %v1903_v19 = vsub.s32 %v307_v13, %v309_v14  ;;  %v339_v22 = vunpack.c.0.s8 %v338_v18  ;;  %s1959_s25 = scalar_lea.vmem %s2094_s1, %s1643_s17 }
  0x3a   : > { %v1907_v29 = vsub.s32 %v339_v22, %v309_v14 }
  0x3c   : > { %271 = vxpose.xlu1.b32.start [1/2] (short) (narrow) %v173_v4, 16  ;;  %239 = vxpose.xlu0.b32.start [1/2] (short) (narrow) %v171_v5, 16 }
  0x40   : > { %272 = vxpose.xlu1.b32.end [2/2] (short) (narrow) %v174_v6, 16  ;;  %240 = vxpose.xlu0.b32.end [2/2] (short) (narrow) %v172_v7, 16 }
  0xb4   : > { %v223_v11 = vpop.trf.xlu1  ;;  %v191_v12 = vpop.trf.xlu0 }
  0xb8   : > { %v224_v15 = vpop.trf.xlu1  ;;  %v192_v16 = vpop.trf.xlu0 }
  0xbc   : > { %v287_v20 = vpop.trf.xlu1  ;;  %v255_v21 = vpop.trf.xlu0 }
  0xbd   : > { %v319_v23 = vcombine.low %v223_v11, %v287_v20  ;;  %v303_v24 = vcombine.low %v191_v12, %v255_v21  ;;  %v320_v27 = vcombine.high %v223_v11, %v287_v20  ;;  %v304_v28 = vcombine.high %v191_v12, %v255_v21 }
  0xbf   : > { %v327_v25 = vrot.slane %v319_v23, %v1903_v19  ;;  %v311_v26 = vrot.slane %v303_v24, %v1903_v19  ;;  %v334_v32 = vrot.slane %v320_v27, %v1903_v19  ;;  %v318_v33 = vrot.slane %v304_v28, %v1903_v19 }
  0xc0   : > { %v288_v37 = vpop.trf.xlu1  ;;  %v256_v38 = vpop.trf.xlu0 }
  0xc1   : > { %v335_v30 = vcombine.low %v311_v26, %v327_v25  ;;  %v336_v31 = vcombine.high %v311_v26, %v327_v25  ;;  %v351_v40 = vcombine.low %v318_v33, %v334_v32  ;;  %v387_v41 = vcombine.low %v224_v15, %v288_v37 }
  0xc2   : > { %v371_v42 = vcombine.low %v192_v16, %v256_v38  ;;  %v352_v45 = vcombine.high %v318_v33, %v334_v32  ;;  %v388_v51 = vcombine.high %v224_v15, %v288_v37  ;;  %v372_v52 = vcombine.high %v192_v16, %v256_v38 }
  0xc3   : > { %v343_v34 = vrot.slane %v335_v30, %v1907_v29  ;;  %v350_v39 = vrot.slane %v336_v31, %v1907_v29  ;;  %v359_v44 = vrot.slane %v351_v40, %v1907_v29  ;;  %v395_v46 = vrot.slane %v387_v41, %v1903_v19 }
  0xc4   : > { %v379_v47 = vrot.slane %v371_v42, %v1903_v19  ;;  %v366_v49 = vrot.slane %v352_v45, %v1907_v29  ;;  %v402_v56 = vrot.slane %v388_v51, %v1903_v19  ;;  %v386_v57 = vrot.slane %v372_v52, %v1903_v19 }
  0xc5   : > { %439 = vxpose.xlu0.b32.start.end [1/1] (short) (narrow) %v343_v34, 16  ;;  %v367_v36 = vcombine.high %v343_v34, %v1791_v35  ;;  %v368_v43 = vcombine.high %v350_v39, %v1791_v35  ;;  %v369_v48 = vcombine.high %v359_v44, %v1791_v35 }
  0xc6   : > { %v403_v50 = vcombine.low %v379_v47, %v395_v46  ;;  %v370_v53 = vcombine.high %v366_v49, %v1791_v35  ;;  %v404_v55 = vcombine.high %v379_v47, %v395_v46  ;;  %v419_v60 = vcombine.low %v386_v57, %v402_v56 }
  0xc7   : > { %471 = vxpose.xlu1.b32.start.end [1/1] (short) (narrow) %v367_v36, 16  ;;  %v420_v63 = vcombine.high %v386_v57, %v402_v56 }
  0xc8   : > { %v411_v54 = vrot.slane %v403_v50, %v1907_v29  ;;  %v418_v59 = vrot.slane %v404_v55, %v1907_v29  ;;  %v427_v62 = vrot.slane %v419_v60, %v1907_v29 }
  0xc9   : > { %v434_v1 = vrot.slane %v420_v63, %v1907_v29 }
  0xca   : > { %503 = vxpose.xlu0.b32.start.end [1/1] (short) (narrow) %v350_v39, 16  ;;  %v435_v58 = vcombine.high %v411_v54, %v1791_v35  ;;  %v436_v61 = vcombine.high %v418_v59, %v1791_v35  ;;  %v437_v0 = vcombine.high %v427_v62, %v1791_v35 }
  0xcb   : > { %v438_v2 = vcombine.high %v434_v1, %v1791_v35 }
  0xcc   : > { %535 = vxpose.xlu1.b32.start.end [1/1] (short) (narrow) %v368_v43, 16 }
  0xcf   : > { %567 = vxpose.xlu0.b32.start.end [1/1] (short) (narrow) %v359_v44, 16 }
  0xd1   : > { %599 = vxpose.xlu1.b32.start.end [1/1] (short) (narrow) %v369_v48, 16 }
  0xd4   : > { %631 = vxpose.xlu0.b32.start.end [1/1] (short) (narrow) %v366_v49, 16 }
  0xd6   : > { %663 = vxpose.xlu1.b32.start.end [1/1] (short) (narrow) %v370_v53, 16 }
  0xd9   : > { %695 = vxpose.xlu0.b32.start.end [1/1] (short) (narrow) %v411_v54, 16 }
  0xdb   : > { %727 = vxpose.xlu1.b32.start.end [1/1] (short) (narrow) %v435_v58, 16 }
  0xde   : > { %759 = vxpose.xlu0.b32.start.end [1/1] (short) (narrow) %v418_v59, 16 }
  0xe0   : > { %791 = vxpose.xlu1.b32.start.end [1/1] (short) (narrow) %v436_v61, 16 }
  0xe3   : > { %823 = vxpose.xlu0.b32.start.end [1/1] (short) (narrow) %v427_v62, 16 }
  0xe5   : > { %855 = vxpose.xlu1.b32.start.end [1/1] (short) (narrow) %v437_v0, 16 }
  0xe8   : > { %887 = vxpose.xlu0.b32.start.end [1/1] (short) (narrow) %v434_v1, 16 }
  0xea   : > { %919 = vxpose.xlu1.b32.start.end [1/1] (short) (narrow) %v438_v2, 16 }
 0x145   : > { %v455_v3 = vpop.trf.xlu0 }
 0x147   : > { %v487_v4 = vpop.trf.xlu1 }
 0x149   : > { %v456_v5 = vpop.trf.xlu0 }
 0x14b   : > { %v488_v6 = vpop.trf.xlu1 }
 0x14d   : > { %v519_v7 = vpop.trf.xlu0 }
 0x14e   : > { %v951_v14 = vcombine.low %v455_v3, %v519_v7  ;;  %v952_v15 = vcombine.high %v455_v3, %v519_v7 }
 0x14f   : > { %v551_v8 = vpop.trf.xlu1 }
 0x150   : > { %v967_v11 = vcombine.low %v487_v4, %v551_v8  ;;  %v968_v12 = vcombine.high %v487_v4, %v551_v8  ;;  %v959_v21 = vrot.slane %v951_v14, %v1903_v19  ;;  %v966_v22 = vrot.slane %v952_v15, %v1903_v19 }
 0x151   : > { %v520_v9 = vpop.trf.xlu0 }
 0x152   : > { %v975_v17 = vrot.slane %v967_v11, %v1903_v19  ;;  %v982_v18 = vrot.slane %v968_v12, %v1903_v19  ;;  %v1223_v23 = vcombine.low %v456_v5, %v520_v9  ;;  %v1224_v27 = vcombine.high %v456_v5, %v520_v9 }
 0x153   : > { %v552_v10 = vpop.trf.xlu1 }
 0x154   : > { %v1239_v24 = vcombine.low %v488_v6, %v552_v10  ;;  %v1015_v26 = vcombine.low %v959_v21, %v975_v17  ;;  %v1016_v28 = vcombine.high %v959_v21, %v975_v17  ;;  %v1031_v30 = vcombine.low %v966_v22, %v982_v18 }
 0x155   : > { %v583_v13 = vpop.trf.xlu0  ;;  %v1032_v31 = vcombine.high %v966_v22, %v982_v18  ;;  %v1240_v32 = vcombine.high %v488_v6, %v552_v10  ;;  %v1231_v36 = vrot.slane %v1223_v23, %v1903_v19  ;;  %v1932_v40 = vrot.slane %v1224_v27, %v1903_v19 }
 0x156   : > { %v1247_v37 = vrot.slane %v1239_v24, %v1903_v19  ;;  %v1023_v39 = vrot.slane %v1015_v26, %v1907_v29  ;;  %v1030_v43 = vrot.slane %v1016_v28, %v1907_v29  ;;  %v1039_v44 = vrot.slane %v1031_v30, %v1907_v29 }
 0x157   : > { %v615_v16 = vpop.trf.xlu1  ;;  %v1046_v45 = vrot.slane %v1032_v31, %v1907_v29  ;;  %v1254_v46 = vrot.slane %v1240_v32, %v1903_v19 }
 0x158   : > { %v1287_v52 = vcombine.low %v1231_v36, %v1247_v37  ;;  %v1288_v53 = vcombine.high %v1231_v36, %v1247_v37 }
 0x159   : > { %v584_v20 = vpop.trf.xlu0  ;;  %v1303_v61 = vcombine.low %v1932_v40, %v1254_v46  ;;  %v1304_v62 = vcombine.high %v1932_v40, %v1254_v46 }
 0x15a   : > { %v1302_v26 = vrot.slane %v1288_v53, %v1907_v29 }
 0x15b   : > { %v616_v25 = vpop.trf.xlu1 }
 0x15d   : > { %v647_v33 = vpop.trf.xlu0 }
 0x15e   : > { %v983_v34 = vcombine.low %v583_v13, %v647_v33  ;;  %v984_v35 = vcombine.high %v583_v13, %v647_v33  ;;  %v1311_v33 = vrot.slane %v1303_v61, %v1907_v29 }
 0x15f   : > { %v679_v38 = vpop.trf.xlu1 }
 0x160   : > { %v999_v41 = vcombine.low %v615_v16, %v679_v38  ;;  %v1000_v42 = vcombine.high %v615_v16, %v679_v38  ;;  %v991_v48 = vrot.slane %v983_v34, %v1903_v19  ;;  %v998_v49 = vrot.slane %v984_v35, %v1903_v19 }
 0x161   : > { %v648_v47 = vpop.trf.xlu0  ;;  %v1318_v34 = vrot.slane %v1304_v62, %v1907_v29 }
 0x162   : > { %v1007_v50 = vrot.slane %v999_v41, %v1903_v19  ;;  %v1014_v51 = vrot.slane %v1000_v42, %v1903_v19  ;;  %v1255_v54 = vcombine.low %v584_v20, %v648_v47  ;;  %v1256_v55 = vcombine.high %v584_v20, %v648_v47 }
 0x163   : > { %v680_v56 = vpop.trf.xlu1 }
 0x164   : > { %v1047_v57 = vcombine.low %v991_v48, %v1007_v50  ;;  %v1048_v58 = vcombine.high %v991_v48, %v1007_v50  ;;  %v1063_v59 = vcombine.low %v998_v49, %v1014_v51  ;;  %v1064_v60 = vcombine.high %v998_v49, %v1014_v51 }
 0x165   : > { %v1271_v63 = vcombine.low %v616_v25, %v680_v56  ;;  %v1272_v0 = vcombine.high %v616_v25, %v680_v56  ;;  %v1950_v1 = vpop.trf.xlu0  ;;  %v1263_v6 = vrot.slane %v1255_v54, %v1903_v19  ;;  %v1270_v7 = vrot.slane %v1256_v55, %v1903_v19 }
 0x166   : > { %v1055_v2 = vrot.slane %v1047_v57, %v1907_v29  ;;  %v1062_v3 = vrot.slane %v1048_v58, %v1907_v29  ;;  %v1071_v4 = vrot.slane %v1063_v59, %v1907_v29  ;;  %v1078_v5 = vrot.slane %v1064_v60, %v1907_v29 }
 0x167   : > { %v1279_v8 = vrot.slane %v1271_v63, %v1903_v19  ;;  %v1286_v9 = vrot.slane %v1272_v0, %v1903_v19  ;;  %v743_v10 = vpop.trf.xlu1  ;;  %v1295_v25 = vrot.slane %v1287_v52, %v1907_v29 }
 0x168   : > { %v1079_v11 = vcombine.low %v1023_v39, %v1055_v2  ;;  %v1080_v12 = vcombine.high %v1023_v39, %v1055_v2  ;;  %v1081_v13 = vcombine.low %v1030_v43, %v1062_v3  ;;  %v1082_v14 = vcombine.high %v1030_v43, %v1062_v3 }
 0x169   : > { %v1083_v15 = vcombine.low %v1039_v44, %v1071_v4  ;;  %v1084_v16 = vcombine.high %v1039_v44, %v1071_v4  ;;  %v1085_v17 = vcombine.low %v1046_v45, %v1078_v5  ;;  %v1086_v18 = vcombine.high %v1046_v45, %v1078_v5  ;;  %v1965_v20 = vpop.trf.xlu0 }
 0x16a   : > { %1496 = vst.msk [vmem:[%s1959_s25] sm:$0xff] %vm1495_vm0, %v1079_v11  ;;  %1498 = vst.msk [vmem:[%s1959_s25 + $0x10] sm:$0xff] %vm1495_vm0, %v1080_v12  ;;  %v1319_v21 = vcombine.low %v1263_v6, %v1279_v8  ;;  %v1320_v22 = vcombine.high %v1263_v6, %v1279_v8  ;;  %v1335_v23 = vcombine.low %v1270_v7, %v1286_v9 }
 0x16b   : > { %1500 = vst.msk [vmem:[%s1959_s25 + $0x20] sm:$0xff] %vm1495_vm0, %v1081_v13  ;;  %1502 = vst.msk [vmem:[%s1959_s25 + $0x30] sm:$0xff] %vm1495_vm0, %v1082_v14  ;;  %v1336_v24 = vcombine.high %v1270_v7, %v1286_v9  ;;  %v744_v27 = vpop.trf.xlu1 }
 0x16c   : > { %1504 = vst.msk [vmem:[%s1959_s25 + $0x40] sm:$0xff] %vm1495_vm0, %v1083_v15  ;;  %1506 = vst.msk [vmem:[%s1959_s25 + $0x50] sm:$0xff] %vm1495_vm0, %v1084_v16  ;;  %v1327_v28 = vrot.slane %v1319_v21, %v1907_v29  ;;  %v1334_v30 = vrot.slane %v1320_v22, %v1907_v29  ;;  %v1343_v31 = vrot.slane %v1335_v23, %v1907_v29 }
 0x16d   : > { %1508 = vst.msk [vmem:[%s1959_s25 + $0x60] sm:$0xff] %vm1495_vm0, %v1085_v17  ;;  %1510 = vst.msk [vmem:[%s1959_s25 + $0x70] sm:$0xff] %vm1495_vm0, %v1086_v18  ;;  %v1350_v32 = vrot.slane %v1336_v24, %v1907_v29  ;;  %v775_v35 = vpop.trf.xlu0 }
 0x16e   : > { %v1351_v36 = vcombine.low %v1295_v25, %v1327_v28  ;;  %v1352_v37 = vcombine.high %v1295_v25, %v1327_v28  ;;  %v1353_v38 = vcombine.low %v1302_v26, %v1334_v30  ;;  %v1354_v39 = vcombine.high %v1302_v26, %v1334_v30 }
 0x16f   : > { %v1355_v40 = vcombine.low %v1311_v33, %v1343_v31  ;;  %v1356_v41 = vcombine.high %v1311_v33, %v1343_v31  ;;  %v1357_v42 = vcombine.low %v1318_v34, %v1350_v32  ;;  %v1358_v43 = vcombine.high %v1318_v34, %v1350_v32  ;;  %v807_v44 = vpop.trf.xlu1 }
 0x170   : > { %1512 = vst.msk [vmem:[%s1959_s25 + $0x80] sm:$0xff] %vm1495_vm0, %v1351_v36  ;;  %1514 = vst.msk [vmem:[%s1959_s25 + $0x90] sm:$0xff] %vm1495_vm0, %v1352_v37  ;;  %v1103_v47 = vcombine.low %v743_v10, %v807_v44  ;;  %v1104_v48 = vcombine.high %v743_v10, %v807_v44  ;;  %v1087_v50 = vcombine.low %v1950_v1, %v775_v35 }
 0x171   : > { %1516 = vst.msk [vmem:[%s1959_s25 + $0xa0] sm:$0xff] %vm1495_vm0, %v1353_v38  ;;  %1518 = vst.msk [vmem:[%s1959_s25 + $0xb0] sm:$0xff] %vm1495_vm0, %v1354_v39  ;;  %v776_v45 = vpop.trf.xlu0  ;;  %v1088_v51 = vcombine.high %v1950_v1, %v775_v35 }
 0x172   : > { %1520 = vst.msk [vmem:[%s1959_s25 + $0xc0] sm:$0xff] %vm1495_vm0, %v1355_v40  ;;  %1522 = vst.msk [vmem:[%s1959_s25 + $0xd0] sm:$0xff] %vm1495_vm0, %v1356_v41  ;;  %v1111_v53 = vrot.slane %v1103_v47, %v1903_v19  ;;  %v1118_v54 = vrot.slane %v1104_v48, %v1903_v19  ;;  %v1095_v56 = vrot.slane %v1087_v50, %v1903_v19 }
 0x173   : > { %1524 = vst.msk [vmem:[%s1959_s25 + $0xe0] sm:$0xff] %vm1495_vm0, %v1357_v42  ;;  %1526 = vst.msk [vmem:[%s1959_s25 + $0xf0] sm:$0xff] %vm1495_vm0, %v1358_v43  ;;  %v808_v46 = vpop.trf.xlu1  ;;  %v1102_v57 = vrot.slane %v1088_v51, %v1903_v19  ;;  %v1359_v58 = vcombine.low %v1965_v20, %v776_v45  ;;  %v1360_v62 = vcombine.high %v1965_v20, %v776_v45 }
 0x174   : > { %v1375_v59 = vcombine.low %v744_v27, %v808_v46  ;;  %v1151_v61 = vcombine.low %v1095_v56, %v1111_v53  ;;  %v1152_v63 = vcombine.high %v1095_v56, %v1111_v53  ;;  %v1376_v2 = vcombine.high %v744_v27, %v808_v46 }
 0x175   : > { %v839_v49 = vpop.trf.xlu0  ;;  %v1167_v0 = vcombine.low %v1102_v57, %v1118_v54  ;;  %v1168_v1 = vcombine.high %v1102_v57, %v1118_v54  ;;  %v1367_v6 = vrot.slane %v1359_v58, %v1903_v19  ;;  %v1374_v10 = vrot.slane %v1360_v62, %v1903_v19 }
 0x176   : > { %v1383_v7 = vrot.slane %v1375_v59, %v1903_v19  ;;  %v1159_v9 = vrot.slane %v1151_v61, %v1907_v29  ;;  %v1166_v13 = vrot.slane %v1152_v63, %v1907_v29  ;;  %v1390_v16 = vrot.slane %v1376_v2, %v1903_v19 }
 0x177   : > { %v871_v52 = vpop.trf.xlu1  ;;  %v1175_v14 = vrot.slane %v1167_v0, %v1907_v29  ;;  %v1182_v15 = vrot.slane %v1168_v1, %v1907_v29 }
 0x178   : > { %v1423_v23 = vcombine.low %v1367_v6, %v1383_v7  ;;  %v1424_v24 = vcombine.high %v1367_v6, %v1383_v7  ;;  %v1439_v33 = vcombine.low %v1374_v10, %v1390_v16  ;;  %v1440_v34 = vcombine.high %v1374_v10, %v1390_v16 }
 0x179   : > { %v840_v55 = vpop.trf.xlu0 }
 0x17a   : > { %v1431_v56 = vrot.slane %v1423_v23, %v1907_v29  ;;  %v1438_v57 = vrot.slane %v1424_v24, %v1907_v29  ;;  %v1447_v62 = vrot.slane %v1439_v33, %v1907_v29  ;;  %v1454_v63 = vrot.slane %v1440_v34, %v1907_v29 }
 0x17b   : > { %v872_v60 = vpop.trf.xlu1 }
 0x17d   : > { %v903_v3 = vpop.trf.xlu0 }
 0x17e   : > { %v1119_v4 = vcombine.low %v839_v49, %v903_v3  ;;  %v1120_v5 = vcombine.high %v839_v49, %v903_v3 }
 0x17f   : > { %v935_v8 = vpop.trf.xlu1 }
 0x180   : > { %v1135_v11 = vcombine.low %v871_v52, %v935_v8  ;;  %v1136_v12 = vcombine.high %v871_v52, %v935_v8  ;;  %v1127_v18 = vrot.slane %v1119_v4, %v1903_v19  ;;  %v1134_v20 = vrot.slane %v1120_v5, %v1903_v19 }
 0x181   : > { %v904_v17 = vpop.trf.xlu0 }
 0x182   : > { %v1143_v21 = vrot.slane %v1135_v11, %v1903_v19  ;;  %v1150_v22 = vrot.slane %v1136_v12, %v1903_v19  ;;  %v1391_v25 = vcombine.low %v840_v55, %v904_v17  ;;  %v1392_v26 = vcombine.high %v840_v55, %v904_v17 }
 0x183   : > { %v936_v27 = vpop.trf.xlu1 }
 0x184   : > { %v1183_v28 = vcombine.low %v1127_v18, %v1143_v21  ;;  %v1184_v30 = vcombine.high %v1127_v18, %v1143_v21  ;;  %v1199_v31 = vcombine.low %v1134_v20, %v1150_v22  ;;  %v1200_v32 = vcombine.high %v1134_v20, %v1150_v22 }
 0x185   : > { %v1407_v35 = vcombine.low %v872_v60, %v936_v27  ;;  %v1408_v36 = vcombine.high %v872_v60, %v936_v27  ;;  %v1399_v41 = vrot.slane %v1391_v25, %v1903_v19  ;;  %v1406_v42 = vrot.slane %v1392_v26, %v1903_v19 }
 0x186   : > { %v1191_v37 = vrot.slane %v1183_v28, %v1907_v29  ;;  %v1198_v38 = vrot.slane %v1184_v30, %v1907_v29  ;;  %v1207_v39 = vrot.slane %v1199_v31, %v1907_v29  ;;  %v1214_v40 = vrot.slane %v1200_v32, %v1907_v29 }
 0x187   : > { %v1415_v43 = vrot.slane %v1407_v35, %v1903_v19  ;;  %v1422_v44 = vrot.slane %v1408_v36, %v1903_v19 }
 0x188   : > { %v1215_v45 = vcombine.low %v1159_v9, %v1191_v37  ;;  %v1216_v46 = vcombine.high %v1159_v9, %v1191_v37  ;;  %v1217_v47 = vcombine.low %v1166_v13, %v1198_v38  ;;  %v1218_v48 = vcombine.high %v1166_v13, %v1198_v38 }
 0x189   : > { %v1219_v49 = vcombine.low %v1175_v14, %v1207_v39  ;;  %v1220_v50 = vcombine.high %v1175_v14, %v1207_v39  ;;  %v1221_v51 = vcombine.low %v1182_v15, %v1214_v40  ;;  %v1222_v52 = vcombine.high %v1182_v15, %v1214_v40 }
 0x18a   : > { %1497 = vst.msk [vmem:[%s1959_s25 + $0x8] sm:$0xff] %vm1495_vm0, %v1215_v45  ;;  %1499 = vst.msk [vmem:[%s1959_s25 + $0x18] sm:$0xff] %vm1495_vm0, %v1216_v46  ;;  %v1455_v19 = vcombine.low %v1399_v41, %v1415_v43  ;;  %v1456_v53 = vcombine.high %v1399_v41, %v1415_v43  ;;  %v1471_v54 = vcombine.low %v1406_v42, %v1422_v44 }
 0x18b   : > { %1501 = vst.msk [vmem:[%s1959_s25 + $0x28] sm:$0xff] %vm1495_vm0, %v1217_v47  ;;  %1503 = vst.msk [vmem:[%s1959_s25 + $0x38] sm:$0xff] %vm1495_vm0, %v1218_v48  ;;  %v1472_v55 = vcombine.high %v1406_v42, %v1422_v44 }
 0x18c   : > { %1505 = vst.msk [vmem:[%s1959_s25 + $0x48] sm:$0xff] %vm1495_vm0, %v1219_v49  ;;  %1507 = vst.msk [vmem:[%s1959_s25 + $0x58] sm:$0xff] %vm1495_vm0, %v1220_v50  ;;  %v1463_v58 = vrot.slane %v1455_v19, %v1907_v29  ;;  %v1470_v59 = vrot.slane %v1456_v53, %v1907_v29  ;;  %v1479_v60 = vrot.slane %v1471_v54, %v1907_v29 }
 0x18d   : > { %1509 = vst.msk [vmem:[%s1959_s25 + $0x68] sm:$0xff] %vm1495_vm0, %v1221_v51  ;;  %1511 = vst.msk [vmem:[%s1959_s25 + $0x78] sm:$0xff] %vm1495_vm0, %v1222_v52  ;;  %v1486_v61 = vrot.slane %v1472_v55, %v1907_v29 }
 0x18e   : > { %v1487_v0 = vcombine.low %v1431_v56, %v1463_v58  ;;  %v1488_v1 = vcombine.high %v1431_v56, %v1463_v58  ;;  %v1489_v2 = vcombine.low %v1438_v57, %v1470_v59  ;;  %v1490_v3 = vcombine.high %v1438_v57, %v1470_v59 }
 0x18f   : > { %v1491_v4 = vcombine.low %v1447_v62, %v1479_v60  ;;  %v1492_v5 = vcombine.high %v1447_v62, %v1479_v60  ;;  %v1493_v6 = vcombine.low %v1454_v63, %v1486_v61  ;;  %v1494_v7 = vcombine.high %v1454_v63, %v1486_v61 }
 0x190   : > { %1513 = vst.msk [vmem:[%s1959_s25 + $0x88] sm:$0xff] %vm1495_vm0, %v1487_v0  ;;  %1515 = vst.msk [vmem:[%s1959_s25 + $0x98] sm:$0xff] %vm1495_vm0, %v1488_v1 }
 0x191   : > { %1517 = vst.msk [vmem:[%s1959_s25 + $0xa8] sm:$0xff] %vm1495_vm0, %v1489_v2  ;;  %1519 = vst.msk [vmem:[%s1959_s25 + $0xb8] sm:$0xff] %vm1495_vm0, %v1490_v3 }
 0x192   : > { %1521 = vst.msk [vmem:[%s1959_s25 + $0xc8] sm:$0xff] %vm1495_vm0, %v1491_v4  ;;  %1523 = vst.msk [vmem:[%s1959_s25 + $0xd8] sm:$0xff] %vm1495_vm0, %v1492_v5 }
 0x193   : > { %1525 = vst.msk [vmem:[%s1959_s25 + $0xe8] sm:$0xff] %vm1495_vm0, %v1493_v6  ;;  %1527 = vst.msk [vmem:[%s1959_s25 + $0xf8] sm:$0xff] %vm1495_vm0, %v1494_v7 }
 0x194 PF: > { %s14_s11 = sadd.s32 1, %s1784_s11   ;;  %s2098_s6 = smov %s1768_s7 }
 0x195   : > { %p11_p9 = scmp.ge.s32.totalorder %s14_s11, 4   ;;  %s2099_s7 = smov %s1772_s8 }
 0x196   : > { %s2100_s8 = smov %s1851_s18  ;;  %s2101_s9 = smov %s1780_s10 }
 0x197   : > { %s2102_s10 = smov %s2104_s13  ;;  %13 = sbr.rel (!%p11_p9) target bundleno = 4 (0x4), region = 64 }
 0x19e   :  { %1560 = vsyncpa [#allocation3], 1 }
 0x19f   :  { %1562 = vsyncpa [#allocation3 + $0x1], 1 }

</bundles_post_ra>
